<compile_context>
chip_gen: v6e
topology: v6e:2x2x1
jax: 0.10.0
libtpu: 0.0.40
codegen_flags: <defaults>
</compile_context>

<pallas_src>
import math

import jax
import jax.numpy as jnp
from jax.experimental import pallas as pl
from jax.experimental.pallas import tpu as pltpu


def coord_mlp_kernel(coords_ref, y_ref, g_ref, wa_sin_ref, wa_cos_ref, ba_ref,
                     wb_ref, loss_ref):
    # coords_ref: (B*C, 2)   flattened xy coords in [0, 1]
    # y_ref:      (B, C)     the y plane, for the per-batch argmax labels
    # g_ref:      (2, n)     gaussian projection matrix
    # wa_sin_ref: (n, H)     rows of Wa that multiply sin(angles)
    # wa_cos_ref: (n, H)     rows of Wa that multiply cos(angles)
    # ba_ref:     (1, H)     bias of layer a
    # wb_ref:     (1, H)     weight of layer b (row vector); b.bias omitted (loss-invariant)

    # ---- PositionEmbeddingRandom._pe_encoding -------------------------------
    coords = 2.0 * coords_ref[...] - 1.0            # map [0,1] -> [-1,1], (B*C, 2)
    cx = coords[:, 0:1]                             # (B*C, 1)
    cy = coords[:, 1:2]                             # (B*C, 1)
    g = g_ref[...]                                  # (2, n)
    # K=2 contraction done as two VPU broadcast FMAs instead of an MXU matmul.
    proj = cx * g[0:1, :] + cy * g[1:2, :]          # (B*C, n)
    ang = (2.0 * math.pi) * proj
    s = jnp.sin(ang)                                # EUP
    c = jnp.cos(ang)                                # EUP

    # ---- MLP: relu(a(pe)) with Wa split -> no [sin | cos] lane concat -------
    h = (jnp.dot(s, wa_sin_ref[...], preferred_element_type=jnp.float32)
         + jnp.dot(c, wa_cos_ref[...], preferred_element_type=jnp.float32)
         + ba_ref[...])                             # (B*C, H)
    h = jnp.maximum(h, 0.0)

    # ---- output layer (out_features = 1): VPU mul + lane reduce, no MXU -----
    preds_col = jnp.sum(h * wb_ref[...], axis=1, keepdims=True)   # (B*C, 1)
    B, C = y_ref.shape
    preds = preds_col.reshape(B, C)                 # single small relayout
    # b.bias is omitted: softmax cross-entropy is shift invariant, so it cancels.

    # ---- labels: argmax of y over C (first-occurrence tie-break) ------------
    y = y_ref[...]                                  # (B, C)
    col = jax.lax.broadcasted_iota(jnp.int32, (B, C), 1)
    y_max = jnp.max(y, axis=1, keepdims=True)
    label = jnp.min(jnp.where(y == y_max, col, C), axis=1, keepdims=True)  # (B, 1)
    one_hot = (col == label).astype(jnp.float32)    # (B, C)

    # ---- cross entropy with one-hot targets, mean over batch ----------------
    m = jnp.max(preds, axis=1, keepdims=True)
    lse = jnp.log(jnp.sum(jnp.exp(preds - m), axis=1, keepdims=True)) + m   # (B, 1)
    picked = jnp.sum(preds * one_hot, axis=1, keepdims=True)                # (B, 1)
    loss_ref[0, 0] = jnp.mean(lse - picked)


def coord_mlp_loss(x, g, wa, ba, wb, bb=None):
    """CoordMlp forward (including the loss reduction) in one Pallas kernel.

    x:  (B, C, 2) coords in [0, 1]
    g:  (2, n) gaussian matrix; wa: (2n, H) [pre-transposed a.weight]; ba: (1, H)
    wb: (H, 1) [pre-transposed b.weight]; bb ignored (cross-entropy shift invariance).
    """
    B, C, d = x.shape
    assert d == 2, "Coords are not 2d"
    n = g.shape[1]
    H = wa.shape[1]

    # Layout plumbing done in the wrapper so the kernel does no input relayouts.
    coords = x.reshape(B * C, 2)          # flattened sample axis
    y_plane = x[:, :, 1]                  # (B, C) y coords for the label argmax
    wa_sin = wa[:n, :]                    # rows multiplying sin(angles)
    wa_cos = wa[n:, :]                    # rows multiplying cos(angles)
    wb_row = wb.reshape(1, H)             # broadcastable row for the VPU output layer
    # bb is intentionally not passed: it cancels exactly in the cross-entropy loss.

    out = pl.pallas_call(
        coord_mlp_kernel,
        out_shape=jax.ShapeDtypeStruct((1, 1), jnp.float32),
        in_specs=[pl.BlockSpec(memory_space=pltpu.MemorySpace.VMEM)] * 7,
        out_specs=pl.BlockSpec(memory_space=pltpu.MemorySpace.SMEM),
    )(coords, y_plane, g, wa_sin, wa_cos, ba, wb_row)
    return out[0, 0]


if __name__ == "__main__":
    # Small shapes consistent with the module: n pos-feats, hidden width,
    # B batches of C 2-D coordinates.
    n, hidden = 8, 32
    B, C = 4, 16

    key = jax.random.PRNGKey(0)
    kx, kg, kaw, kab, kbw, kbb = jax.random.split(key, 6)

    # Coordinates in [0, 1] (as the SAM-style positional embedding expects).
    x = jax.random.uniform(kx, (B, C, 2), dtype=jnp.float32)

    # PositionEmbeddingRandom gaussian matrix: scale * randn(2, n), scale = 1.0.
    g = jax.random.normal(kg, (2, n), dtype=jnp.float32)

    # nn.Linear default init: U(-1/sqrt(fan_in), 1/sqrt(fan_in)); stored transposed.
    lim_a = 1.0 / math.sqrt(2 * n)
    wa = jax.random.uniform(kaw, (2 * n, hidden), minval=-lim_a, maxval=lim_a,
                            dtype=jnp.float32)
    ba = jax.random.uniform(kab, (1, hidden), minval=-lim_a, maxval=lim_a,
                            dtype=jnp.float32)
    lim_b = 1.0 / math.sqrt(hidden)
    wb = jax.random.uniform(kbw, (hidden, 1), minval=-lim_b, maxval=lim_b,
                            dtype=jnp.float32)
    bb = jax.random.uniform(kbb, (1, 1), minval=-lim_b, maxval=lim_b,
                            dtype=jnp.float32)

    loss = coord_mlp_loss(x, g, wa, ba, wb, bb)
    loss = jax.block_until_ready(loss)
    assert bool(jnp.isfinite(loss)), f"loss is not finite: {loss}"
    print("KERNEL_OK")
</pallas_src>

<mosaic_0001>
module attributes {stable_mosaic.version = 11 : i64} {
  func.func @coord_mlp_kernel(%arg0: memref<64x2xf32, #tpu.memory_space<vmem>>, %arg1: memref<4x16xf32, #tpu.memory_space<vmem>>, %arg2: memref<2x8xf32, #tpu.memory_space<vmem>>, %arg3: memref<8x32xf32, #tpu.memory_space<vmem>>, %arg4: memref<8x32xf32, #tpu.memory_space<vmem>>, %arg5: memref<1x32xf32, #tpu.memory_space<vmem>>, %arg6: memref<1x32xf32, #tpu.memory_space<vmem>>, %arg7: memref<1x1xf32, #tpu.memory_space<smem>>) attributes {dimension_semantics = [], scalar_prefetch = 0 : i64, scratch_operands = 0 : i64, tpu.core_type = #tpu.core_type<tc>} {
    %c0 = arith.constant 0 : index
    %c0_0 = arith.constant 0 : index
    %0 = vector.load %arg0[%c0, %c0_0] : memref<64x2xf32, #tpu.memory_space<vmem>>, vector<64x2xf32>
    %cst = arith.constant 2.000000e+00 : f32
    %1 = vector.broadcast %cst : f32 to vector<64x2xf32>
    %2 = arith.mulf %1, %0 : vector<64x2xf32>
    %cst_1 = arith.constant 1.000000e+00 : f32
    %3 = vector.broadcast %cst_1 : f32 to vector<64x2xf32>
    %4 = arith.subf %2, %3 : vector<64x2xf32>
    %5 = vector.extract_strided_slice %4 {offsets = [0, 0], sizes = [64, 1], strides = [1, 1]} : vector<64x2xf32> to vector<64x1xf32>
    %6 = vector.extract_strided_slice %4 {offsets = [0, 1], sizes = [64, 1], strides = [1, 1]} : vector<64x2xf32> to vector<64x1xf32>
    %c0_2 = arith.constant 0 : index
    %c0_3 = arith.constant 0 : index
    %7 = vector.load %arg2[%c0_2, %c0_3] : memref<2x8xf32, #tpu.memory_space<vmem>>, vector<2x8xf32>
    %8 = vector.extract_strided_slice %7 {offsets = [0, 0], sizes = [1, 8], strides = [1, 1]} : vector<2x8xf32> to vector<1x8xf32>
    %9 = vector.broadcast %5 : vector<64x1xf32> to vector<64x8xf32>
    %10 = vector.broadcast %8 : vector<1x8xf32> to vector<64x8xf32>
    %11 = arith.mulf %9, %10 : vector<64x8xf32>
    %12 = vector.extract_strided_slice %7 {offsets = [1, 0], sizes = [1, 8], strides = [1, 1]} : vector<2x8xf32> to vector<1x8xf32>
    %13 = vector.broadcast %6 : vector<64x1xf32> to vector<64x8xf32>
    %14 = vector.broadcast %12 : vector<1x8xf32> to vector<64x8xf32>
    %15 = arith.mulf %13, %14 : vector<64x8xf32>
    %16 = arith.addf %11, %15 : vector<64x8xf32>
    %cst_4 = arith.constant 6.28318548 : f32
    %17 = vector.broadcast %cst_4 : f32 to vector<64x8xf32>
    %18 = arith.mulf %17, %16 : vector<64x8xf32>
    %19 = math.sin %18 : vector<64x8xf32>
    %20 = math.cos %18 : vector<64x8xf32>
    %c0_5 = arith.constant 0 : index
    %c0_6 = arith.constant 0 : index
    %21 = vector.load %arg3[%c0_5, %c0_6] : memref<8x32xf32, #tpu.memory_space<vmem>>, vector<8x32xf32>
    %cst_7 = arith.constant dense<0.000000e+00> : vector<64x32xf32>
    %22 = tpu.matmul %19, %21, %cst_7 {dimension_numbers = #tpu.dot_dimension_numbers<[1], [0], [0], [1], [0, 0, 1, 1], [], []>} : vector<64x8xf32>, vector<8x32xf32>, vector<64x32xf32> -> vector<64x32xf32>
    %c0_8 = arith.constant 0 : index
    %c0_9 = arith.constant 0 : index
    %23 = vector.load %arg4[%c0_8, %c0_9] : memref<8x32xf32, #tpu.memory_space<vmem>>, vector<8x32xf32>
    %cst_10 = arith.constant dense<0.000000e+00> : vector<64x32xf32>
    %24 = tpu.matmul %20, %23, %cst_10 {dimension_numbers = #tpu.dot_dimension_numbers<[1], [0], [0], [1], [0, 0, 1, 1], [], []>} : vector<64x8xf32>, vector<8x32xf32>, vector<64x32xf32> -> vector<64x32xf32>
    %25 = arith.addf %22, %24 : vector<64x32xf32>
    %c0_11 = arith.constant 0 : index
    %c0_12 = arith.constant 0 : index
    %26 = vector.load %arg5[%c0_11, %c0_12] : memref<1x32xf32, #tpu.memory_space<vmem>>, vector<1x32xf32>
    %27 = vector.broadcast %26 : vector<1x32xf32> to vector<64x32xf32>
    %28 = arith.addf %25, %27 : vector<64x32xf32>
    %cst_13 = arith.constant 0.000000e+00 : f32
    %29 = vector.broadcast %cst_13 : f32 to vector<64x32xf32>
    %30 = arith.maximumf %28, %29 : vector<64x32xf32>
    %c0_14 = arith.constant 0 : index
    %c0_15 = arith.constant 0 : index
    %31 = vector.load %arg6[%c0_14, %c0_15] : memref<1x32xf32, #tpu.memory_space<vmem>>, vector<1x32xf32>
    %32 = vector.broadcast %31 : vector<1x32xf32> to vector<64x32xf32>
    %33 = arith.mulf %30, %32 : vector<64x32xf32>
    %cst_16 = arith.constant dense<0.000000e+00> : vector<64xf32>
    %34 = vector.multi_reduction <add>, %33, %cst_16 [1] : vector<64x32xf32> to vector<64xf32>
    %35 = vector.shape_cast %34 : vector<64xf32> to vector<64x1xf32>
    %36 = vector.shape_cast %35 : vector<64x1xf32> to vector<4x16xf32>
    %c0_17 = arith.constant 0 : index
    %c0_18 = arith.constant 0 : index
    %37 = vector.load %arg1[%c0_17, %c0_18] : memref<4x16xf32, #tpu.memory_space<vmem>>, vector<4x16xf32>
    %38 = tpu.iota {dimensions = array<i32: 1>} : vector<4x16xi32>
    %cst_19 = arith.constant dense<0xFF800000> : vector<4xf32>
    %39 = vector.multi_reduction <maximumf>, %37, %cst_19 [1] : vector<4x16xf32> to vector<4xf32>
    %40 = vector.shape_cast %39 : vector<4xf32> to vector<4x1xf32>
    %41 = vector.broadcast %40 : vector<4x1xf32> to vector<4x16xf32>
    %42 = arith.cmpf oeq, %37, %41 : vector<4x16xf32>
    %c16_i32 = arith.constant 16 : i32
    %43 = vector.broadcast %c16_i32 : i32 to vector<4x16xi32>
    %44 = arith.select %42, %38, %43 : vector<4x16xi1>, vector<4x16xi32>
    %cst_20 = arith.constant dense<2147483647> : vector<4xi32>
    %45 = vector.multi_reduction <minsi>, %44, %cst_20 [1] : vector<4x16xi32> to vector<4xi32>
    %46 = vector.shape_cast %45 : vector<4xi32> to vector<4x1xi32>
    %47 = vector.broadcast %46 : vector<4x1xi32> to vector<4x16xi32>
    %48 = arith.cmpi eq, %38, %47 : vector<4x16xi32>
    %49 = arith.extui %48 : vector<4x16xi1> to vector<4x16xi32>
    %50 = arith.sitofp %49 : vector<4x16xi32> to vector<4x16xf32>
    %cst_21 = arith.constant dense<0xFF800000> : vector<4xf32>
    %51 = vector.multi_reduction <maximumf>, %36, %cst_21 [1] : vector<4x16xf32> to vector<4xf32>
    %52 = vector.shape_cast %51 : vector<4xf32> to vector<4x1xf32>
    %53 = vector.broadcast %52 : vector<4x1xf32> to vector<4x16xf32>
    %54 = arith.subf %36, %53 : vector<4x16xf32>
    %55 = math.exp %54 : vector<4x16xf32>
    %cst_22 = arith.constant dense<0.000000e+00> : vector<4xf32>
    %56 = vector.multi_reduction <add>, %55, %cst_22 [1] : vector<4x16xf32> to vector<4xf32>
    %57 = vector.shape_cast %56 : vector<4xf32> to vector<4x1xf32>
    %58 = math.log %57 : vector<4x1xf32>
    %59 = arith.addf %58, %52 : vector<4x1xf32>
    %60 = arith.mulf %36, %50 : vector<4x16xf32>
    %cst_23 = arith.constant dense<0.000000e+00> : vector<4xf32>
    %61 = vector.multi_reduction <add>, %60, %cst_23 [1] : vector<4x16xf32> to vector<4xf32>
    %62 = vector.shape_cast %61 : vector<4xf32> to vector<4x1xf32>
    %63 = arith.subf %59, %62 : vector<4x1xf32>
    %64 = vector.shape_cast %63 : vector<4x1xf32> to vector<1x4x1xf32>
    %cst_24 = arith.constant dense<0.000000e+00> : vector<1xf32>
    %65 = vector.multi_reduction <add>, %64, %cst_24 [1, 2] : vector<1x4x1xf32> to vector<1xf32>
    %66 = vector.shape_cast %65 : vector<1xf32> to vector<1x1x1xf32>
    %67 = vector.extract %66[0, 0, 0] : f32 from vector<1x1x1xf32>
    %cst_25 = arith.constant 4.000000e+00 : f32
    %68 = arith.divf %67, %cst_25 : f32
    %c0_26 = arith.constant 0 : index
    %c0_27 = arith.constant 0 : index
    %69 = memref.load %arg7[%c0_26, %c0_27] : memref<1x1xf32, #tpu.memory_space<smem>>
    memref.store %68, %arg7[%c0_26, %c0_27] : memref<1x1xf32, #tpu.memory_space<smem>>
    return
  }
}

</mosaic_0001>

<bundles_post_ra>
// kernel: tpu_custom_call.1
= control target key start
LH: loop header
LB: loop body
LE: loop exit
PB: predicated region body
PF: predicated region fallthrough
CT: control target
= control target key end

     0   :  { %v2763_v2 = vmov 0   ;;  %s4055_s0 = inlined_call_operand.vmem [shape: f32[64,2], index: 0, kind: input, shape index: {}]   ;;  %s4056_s1 = inlined_call_operand.vmem [shape: f32[4,16], index: 1, kind: input, shape index: {}]   ;;  %s4057_s2 = inlined_call_operand.vmem [shape: f32[2,8], index: 2, kind: input, shape index: {}]   ;;  %s4058_s3 = inlined_call_operand.vmem [shape: f32[8,32], index: 3, kind: input, shape index: {}]   ;;  %s4059_s4 = inlined_call_operand.vmem [shape: f32[8,32], index: 4, kind: input, shape index: {}]   ;;  %s4060_s5 = inlined_call_operand.vmem [shape: f32[1,32], index: 5, kind: input, shape index: {}]   ;;  %s4061_s6 = inlined_call_operand.vmem [shape: f32[1,32], index: 6, kind: input, shape index: {}]   ;;  %s4062_s7 = inlined_call_operand.hbm [shape: f32[1,1], index: 7, kind: output, shape index: {}]  }
   0x1   :  { %v28_v0 = vld [vmem:[%s4055_s0 + $0x8] sm:$0xff]  ;;  %v27_v1 = vld [vmem:[%s4055_s0] sm:$0xff]  ;;  %2699 = vset.pattern.permute.xlu1 %v2763_v2  ;;  %2697 = vset.pattern.permute.xlu0 %v2763_v2  ;;  %v29_v7 = vld [vmem:[%s4055_s0 + $0x10] sm:$0xff] }
   0x2   :  { %v36_v3 = vmul.f32 2.0, %v28_v0  ;;  %v35_v4 = vmul.f32 2.0, %v27_v1 }
   0x4   :  { %v2517_v5 = vadd.f32 -1.0, %v36_v3  ;;  %v2516_v6 = vadd.f32 -1.0, %v35_v4 }
   0x6   :  { %59 = vperm.xlu1 %2699, %v2517_v5   ;;  %54 = vperm.xlu0 %2697, %v2516_v6  }
   0x7   :  { %12 = vsyncpa [#allocation3], 0  ;;  %v37_v8 = vmul.f32 2.0, %v29_v7  ;;  %v30_v9 = vld [vmem:[%s4055_s0 + $0x18] sm:$0xff]  ;;  %v2764_v10 = vmov 1   ;;  %v31_v13 = vld [vmem:[%s4055_s0 + $0x20] sm:$0xff]  ;;  %v92_v30 = vlaneseq }
   0x8   :  { %v38_v12 = vmul.f32 2.0, %v30_v9  ;;  %v39_v15 = vmul.f32 2.0, %v31_v13  ;;  %v32_v16 = vld [vmem:[%s4055_s0 + $0x28] sm:$0xff]  ;;  %v33_v19 = vld [vmem:[%s4055_s0 + $0x30] sm:$0xff]  ;;  %v34_v22 = vld [vmem:[%s4055_s0 + $0x38] sm:$0xff]  ;;  %vm2147_vm0 = vcmask 125952  }
   0x9   :  { %v2518_v11 = vadd.f32 -1.0, %v37_v8  ;;  %v40_v18 = vmul.f32 2.0, %v32_v16  ;;  %v41_v21 = vmul.f32 2.0, %v33_v19  ;;  %v42_v24 = vmul.f32 2.0, %v34_v22  ;;  %v1821_v26 = vld [vmem:[%s4059_s4] sm:$0xff]  ;;  %s2772_s24 = smov [#allocation2]  }
   0xa   :  { %2700 = vset.pattern.permute.xlu1 %v2764_v10  ;;  %2698 = vset.pattern.permute.xlu0 %v2764_v10  ;;  %v2519_v14 = vadd.f32 -1.0, %v38_v12  ;;  %v2520_v17 = vadd.f32 -1.0, %v39_v15  ;;  %v1820_v27 = vld [vmem:[%s4058_s3] sm:$0xff]  ;;  %v2851_v31 = vshrl.u32 %v92_v30, 7 }
   0xb   :  { %109 = vperm.xlu1 %2700, %v2517_v5   ;;  %105 = vperm.xlu0 %2698, %v2516_v6   ;;  %v2521_v20 = vadd.f32 -1.0, %v40_v18  ;;  %v2522_v23 = vadd.f32 -1.0, %v41_v21  ;;  %v2523_v25 = vadd.f32 -1.0, %v42_v24  ;;  %v2846_v28 = vld [vmem:[%s4056_s1] sm:$0xf] }
   0xc   :  { %2625 = vmatprep.subr.mxu0 %v1821_v26  ;;  %2639 = vmatprep.subr.mxu1 %v1820_v27  ;;  %v2148_v29 = vsel %vm2147_vm0, %v2846_v28, -inf  ;;  %4097 = vst [vmem:[#allocation5_spill] sm:$0xff] %v2851_v31  ;;  %v2854_v32 = vsub.s32 0, %v2851_v31  ;;  %v2857_v33 = vsub.s32 1, %v2851_v31  ;;  %v51_v34 = vld [vmem:[%s4057_s2] sm:$0x3] }
   0xd   :  { %2626 = vmatpush3.msra.mxu0 %v1821_v26  ;;  %2640 = vmatpush3.msra.mxu1 %v1820_v27 }
   0xe   :  { %4098 = vst [vmem:[#allocation6_spill] sm:$0xff] %v2854_v32  ;;  %4099 = vst [vmem:[#allocation7_spill] sm:$0xff] %v2857_v33  ;;  %v2863_v37 = vrot.slane %v51_v34, %v2854_v32  ;;  %v2866_v38 = vrot.slane %v51_v34, %v2857_v33 }
   0xf   :  { %2701 = vset.pattern.permute.xlu1 %v2763_v2  ;;  %113 = vperm.xlu0 %2698, %v2518_v11  }
  0x10   :  { %64 = vperm.xlu1 %2701, %v2518_v11  }
  0x13   :  { %117 = vperm.xlu0 %2698, %v2519_v14  }
  0x14   :  { %69 = vperm.xlu1 %2701, %v2519_v14  }
  0x17   :  { %121 = vperm.xlu0 %2698, %v2520_v17  }
  0x18   :  { %74 = vperm.xlu1 %2701, %v2520_v17  }
  0x1b   :  { %125 = vperm.xlu0 %2698, %v2521_v20  }
  0x1c   :  { %79 = vperm.xlu1 %2701, %v2521_v20  }
  0x1f   :  { %129 = vperm.xlu0 %2698, %v2522_v23  }
  0x20   :  { %84 = vperm.xlu1 %2701, %v2522_v23  }
  0x23   :  { %133 = vperm.xlu0 %2698, %v2523_v25  }
  0x24   :  { %89 = vperm.xlu1 %2701, %v2523_v25  }
  0x27   :  { %2702 = vset.pattern.permute.xlu0 %v2763_v2 }
  0x48   :  { %2149 = vmax.xlane.f32.xlu1 %v2148_v29 }
  0x81   :  { %v60_v35 = vpop.permute.xlu1 %59  ;;  %v55_v36 = vpop.permute.xlu0 %54 }
  0x82   :  { %v97_v41 = vmul.f32 %v2863_v37, %v60_v35  ;;  %v96_v44 = vmul.f32 %v2863_v37, %v55_v36 }
  0x86   :  { %v110_v39 = vpop.permute.xlu1 %109  ;;  %v106_v40 = vpop.permute.xlu0 %105 }
  0x87   :  { %v141_v42 = vmul.f32 %v2866_v38, %v110_v39  ;;  %v140_v43 = vmul.f32 %v2866_v38, %v106_v40 }
  0x89   :  { %v149_v45 = vadd.f32 %v141_v42, %v97_v41  ;;  %v148_v48 = vadd.f32 %v140_v43, %v96_v44 }
  0x8a   :  { %v114_v46 = vpop.permute.xlu0 %113 }
  0x8b   :  { %v2872_v47 = vmul.f32 6.2831855, %v149_v45  ;;  %v65_v49 = vpop.permute.xlu1 %64  ;;  %v142_v51 = vmul.f32 %v2866_v38, %v114_v46  ;;  %v2877_v54 = vmul.f32 6.2831855, %v148_v48 }
  0x8c   :  { %v98_v52 = vmul.f32 %v2863_v37, %v65_v49 }
  0x8d   :  { %v271_v50 = vand.u32 2139095040, %v2872_v47  ;;  %v167_v59 = vand.u32 2139095040, %v2877_v54  ;;  %v4064_v17 = vand.u32 2147483647, %v2877_v54  ;;  %v4063_v20 = vand.u32 2147483647, %v2872_v47 }
  0x8e   :  { %v118_v53 = vpop.permute.xlu0 %117  ;;  %v150_v57 = vadd.f32 %v142_v51, %v98_v52 }
  0x8f   :  { %v70_v55 = vpop.permute.xlu1 %69  ;;  %v272_v56 = vshrl.u32 %v271_v50, 23  ;;  %v168_v2 = vshrl.u32 %v167_v59, 23  ;;  %v143_v3 = vmul.f32 %v2866_v38, %v118_v53  ;;  %v171_v25 = vand.u32 8388607, %v4064_v17 }
  0x90   :  { %v2882_v0 = vmul.f32 6.2831855, %v150_v57  ;;  %v99_v4 = vmul.f32 %v2863_v37, %v70_v55  ;;  %v275_v41 = vand.u32 8388607, %v4063_v20 }
  0x91   :  { %v2528_v63 = vadd.s32 4294967169, %v272_v56  ;;  %v2524_v11 = vadd.s32 4294967169, %v168_v2  ;;  %v172_v50 = vor.u32 8388608, %v171_v25  ;;  %v4065_v25 = vmov 2102212464  }
  0x92   :  { %v122_v58 = vpop.permute.xlu0 %121  ;;  %v375_v9 = vand.u32 2139095040, %v2882_v0  ;;  %v151_v12 = vadd.f32 %v143_v3, %v99_v4  ;;  %v276_v53 = vor.u32 8388608, %v275_v41 }
  0x93   :  { %v75_v60 = vpop.permute.xlu1 %74  ;;  %v144_v61 = vmul.f32 %v2866_v38, %v122_v58  ;;  %v278_v8 = vadd.s32 1, %v2528_v63  ;;  %v174_v21 = vadd.s32 1, %v2524_v11  ;;  %v2924_v63 = vand.u32 127, %v92_v30 }
  0x94   :  { %v100_v62 = vmul.f32 %v2863_v37, %v75_v60  ;;  %v376_v19 = vshrl.u32 %v375_v9, 23  ;;  %v2894_v22 = vmul.f32 6.2831855, %v151_v12  ;;  %v2931_v3 = vshll.u32 %v276_v53, 8 }
  0x95   :  { %vm279_vm1 = vcmp.gt.s32.totalorder %v278_v8, 0  ;;  %vm175_vm2 = vcmp.gt.s32.totalorder %v174_v21, 0  ;;  %v4075_v9 = vmov 1326507024   ;;  %v4067_v53 = vmov 2131351028  }
  0x96   :  { %v126_v1 = vpop.permute.xlu0 %125  ;;  %v152_v6 = vadd.f32 %v144_v61, %v100_v62  ;;  %v280_v26 = vsel %vm279_vm1, %v278_v8, 0  ;;  %v2532_v36 = vadd.s32 4294967169, %v376_v19  ;;  %v479_v42 = vand.u32 2139095040, %v2894_v22 }
  0x97   :  { %v80_v5 = vpop.permute.xlu1 %79  ;;  %v145_v7 = vmul.f32 %v2866_v38, %v126_v1  ;;  %v2906_v43 = vand.u32 31, %v280_v26  ;;  %v176_v55 = vsel %vm175_vm2, %v174_v21, 0  ;;  %v2921_v62 = vshll.u32 %v172_v50, 8 }
  0x98   :  { %v2888_v10 = vmul.f32 6.2831855, %v152_v6  ;;  %v101_v13 = vmul.f32 %v2863_v37, %v80_v5  ;;  %v382_v51 = vadd.s32 1, %v2532_v36  ;;  %v480_v56 = vshrl.u32 %v479_v42, 23 }
  0x99   :  { %v2915_v59 = vsub.s32 32, %v2906_v43  ;;  %v2926_v1 = vand.u32 31, %v176_v55  ;;  %v2953_v19 = vshrl.u32 %v176_v55, 5 }
  0x9a   :  { %v130_v14 = vpop.permute.xlu0 %129  ;;  %v583_v15 = vand.u32 2139095040, %v2888_v10  ;;  %v153_v18 = vadd.f32 %v145_v7, %v101_v13  ;;  %vm383_vm4 = vcmp.gt.s32.totalorder %v382_v51, 0  ;;  %v2536_v4 = vadd.s32 4294967169, %v480_v56 }
  0x9b   :  { %v85_v16 = vpop.permute.xlu1 %84  ;;  %v146_v29 = vmul.f32 %v2866_v38, %v130_v14  ;;  %v4076_v7 = vmov 920167782   ;;  %v384_v13 = vsel %vm383_vm4, %v382_v51, 0  ;;  %v179_v21 = vsub.s32 32, %v2926_v1 }
  0x9c   :  { %v584_v23 = vshrl.u32 %v583_v15, 23  ;;  %v2896_v24 = vmul.f32 6.2831855, %v153_v18  ;;  %v102_v34 = vmul.f32 %v2863_v37, %v85_v16  ;;  %v295_v8 = vshrl.u32 %v4076_v7, %v2915_v59 }
  0x9d   :  { %v2951_v18 = vshrl.u32 %v280_v26, 5  ;;  %v2973_v36 = vand.u32 31, %v384_v13  ;;  %v486_v42 = vadd.s32 1, %v2536_v4  ;;  %v188_v50 = vshrl.u32 %v4065_v25, %v179_v21 }
  0x9e   :  { %v2540_v27 = vadd.s32 4294967169, %v584_v23  ;;  %v134_v35 = vpop.permute.xlu0 %133  ;;  %v687_v39 = vand.u32 2139095040, %v2896_v24  ;;  %v154_v48 = vadd.f32 %v146_v29, %v102_v34  ;;  %v2962_v29 = vshll.u32 %v4076_v7, %v2906_v43 }
  0x9f   :  { %v90_v40 = vpop.permute.xlu1 %89  ;;  %v147_v46 = vmul.f32 %v2866_v38, %v134_v35  ;;  %v2966_v34 = vshrl.u32 %v4075_v9, %v2915_v59  ;;  %v2971_v35 = vshrl.u32 %v384_v13, 5  ;;  %vm303_vm6 = vcmp.lt.s32.totalorder %v2951_v18, 4 }
  0xa0   :  { %v590_v44 = vadd.s32 1, %v2540_v27  ;;  %v688_v45 = vshrl.u32 %v687_v39, 23  ;;  %v103_v49 = vmul.f32 %v2863_v37, %v90_v40  ;;  %v2912_v58 = vmul.f32 6.2831855, %v154_v48 }
  0xa1   :  { %v294_v27 = vshll.u32 %v4065_v25, %v2906_v43  ;;  %v4069_v48 = vmov 2475754826   ;;  %v185_v55 = vshrl.u32 %v4067_v53, %v179_v21  ;;  %v191_v56 = vshrl.u32 %v4076_v7, %v179_v21 }
  0xa2   :  { %vm591_vm3 = vcmp.gt.s32.totalorder %v590_v44, 0  ;;  %v2544_v52 = vadd.s32 4294967169, %v688_v45  ;;  %4100 = vst [vmem:[#allocation8_spill] sm:$0xff] %v2912_v58  ;;  %v155_v61 = vadd.f32 %v147_v46, %v103_v49  ;;  %v791_v37 = vand.u32 2139095040, %v2912_v58 }
  0xa3   :  { %v2910_v57 = vsel %vm591_vm3, %v590_v44, 0  ;;  %v2975_v41 = vor.u32 %v295_v8, %v294_v27  ;;  %v182_v49 = vshrl.u32 %v4069_v48, %v179_v21  ;;  %v187_v4 = vshll.u32 %v4067_v53, %v2926_v1 }
  0xa4   :  { %v2918_v60 = vand.u32 31, %v2910_v57  ;;  %v694_v38 = vadd.s32 1, %v2544_v52  ;;  %v792_v5 = vshrl.u32 %v791_v37, 23  ;;  %v2933_v6 = vmul.f32 6.2831855, %v155_v61 }
  0xa5   :  { %v4071_v8 = vmov 683565275   ;;  %vm487_vm8 = vcmp.gt.s32.totalorder %v486_v42, 0  ;;  %v193_v17 = vshll.u32 %v4076_v7, %v2926_v1  ;;  %vm199_vm10 = vcmp.lt.s32.totalorder %v2953_v19, 4 }
  0xa6   :  { %v2929_v2 = vsub.s32 32, %v2918_v60  ;;  %vm695_vm5 = vcmp.gt.s32.totalorder %v694_v38, 0  ;;  %4101 = vst [vmem:[#allocation9_spill] sm:$0xff] %v2933_v6  ;;  %v2939_v30 = vshll.u32 %v4076_v7, %v2918_v60  ;;  %v2548_v15 = vadd.s32 4294967169, %v792_v5 }
  0xa7   :  { %v2945_v12 = vsel %vm695_vm5, %v694_v38, 0  ;;  %v895_v16 = vand.u32 2139095040, %v2933_v6  ;;  %v299_v38 = vor.u32 %v2966_v34, %v2962_v29  ;;  %v3002_v5 = vsub.s32 32, %v2973_v36 }
  0xa8   :  { %v2943_v11 = vshrl.u32 %v4075_v9, %v2929_v2  ;;  %v2948_v14 = vand.u32 31, %v2945_v12  ;;  %v798_v39 = vadd.s32 1, %v2548_v15  ;;  %v181_v13 = vshll.u32 %v4071_v8, %v2926_v1 }
  0xa9   :  { %v896_v40 = vshrl.u32 %v895_v16, 23  ;;  %v184_v15 = vshll.u32 %v4069_v48, %v2926_v1  ;;  %v190_v16 = vshll.u32 %v4065_v25, %v2926_v1  ;;  %v189_v29 = vor.u32 %v188_v50, %v187_v4 }
  0xaa   :  { %v2969_v26 = vsub.s32 32, %v2948_v14  ;;  %v2979_v44 = vshll.u32 %v4076_v7, %v2948_v14  ;;  %vm799_vm7 = vcmp.gt.s32.totalorder %v798_v39, 0  ;;  %v194_v34 = vshrl.u32 %v4075_v9, %v179_v21 }
  0xab   :  { %v2552_v46 = vadd.s32 4294967169, %v896_v40  ;;  %v2990_v52 = vsel %vm799_vm7, %v798_v39, 0  ;;  %v183_v39 = vor.u32 %v182_v49, %v181_v13  ;;  %v186_v40 = vor.u32 %v185_v55, %v184_v15 }
  0xac   :  { %4102 = vst [vmem:[#allocation10_spill] sm:$0xff] %v2979_v44  ;;  %v2983_v45 = vshrl.u32 %v4075_v9, %v2969_v26  ;;  %v2997_v61 = vand.u32 31, %v2990_v52  ;;  %v3028_v50 = vshll.u32 %v4065_v25, %v2973_v36  ;;  %v180_v55 = vshrl.u32 %v4071_v8, %v179_v21 }
  0xad   :  { %v902_v37 = vadd.s32 1, %v2552_v46  ;;  %v192_v46 = vor.u32 %v191_v56, %v190_v16  ;;  %v195_v4 = vor.u32 %v194_v34, %v193_v17  ;;  %vm196_vm11 = vcmp.lt.s32.totalorder %v2953_v19, 1 }
  0xae   :  { %v3011_v27 = vsub.s32 32, %v2997_v61  ;;  %v3016_v51 = vshll.u32 %v4076_v7, %v2997_v61  ;;  %v201_v1 = vsel %vm199_vm10, %v189_v29, 2102212464  ;;  %v488_v13 = vsel %vm487_vm8, %v486_v42, 0 }
  0xaf   :  { %vm903_vm9 = vcmp.gt.s32.totalorder %v902_v37, 0  ;;  %v204_v21 = vsel %vm196_vm11, %v183_v39, %v186_v40  ;;  %vm197_vm12 = vcmp.lt.s32.totalorder %v2953_v19, 2  ;;  %vm198_vm13 = vcmp.lt.s32.totalorder %v2953_v19, 3 }
  0xb0   :  { %4103 = vst [vmem:[#allocation11_spill] sm:$0xff] %v3016_v51  ;;  %v3020_v20 = vshrl.u32 %v4075_v9, %v3011_v27  ;;  %v3022_v23 = vsel %vm903_vm9, %v902_v37, 0  ;;  %v309_v37 = vsel %vm303_vm6, %v2975_v41, 920167782  ;;  %v200_v17 = vsel %vm196_vm11, %v180_v55, %v183_v39 }
  0xb1   :  { %4105 = vst [vmem:[#allocation13_spill] sm:$0xff] %v3022_v23  ;;  %v3031_v49 = vand.u32 31, %v3022_v23  ;;  %v205_v16 = vsel %vm199_vm10, %v192_v46, 920167782  ;;  %v202_v56 = vsel %vm198_vm13, %v186_v40, %v201_v1  ;;  %v313_v53 = vsel %vm303_vm6, %v299_v38, 1326507024 }
  0xb2   :  { %4104 = vst [vmem:[#allocation12_spill] sm:$0xff] %v3020_v20  ;;  %v206_v25 = vsel %vm198_vm13, %v189_v29, %v205_v16  ;;  %v208_v39 = vsel %vm196_vm11, %v186_v40, %v189_v29  ;;  %v209_v55 = vsel %vm199_vm10, %v195_v4, 1326507024  ;;  %v399_v8 = vshrl.u32 %v4076_v7, %v3002_v5 }
  0xb3   :  { %4106 = vst [vmem:[#allocation14_spill] sm:$0xff] %v3031_v49  ;;  %v3045_v15 = vsub.s32 32, %v3031_v49  ;;  %v3057_v34 = vshll.u32 %v4076_v7, %v3031_v49  ;;  %v207_v48 = vsel %vm197_vm12, %v204_v21, %v206_v25  ;;  %v3073_v33 = vand.u32 31, %v488_v13 }
  0xb4   :  { %v210_v16 = vsel %vm198_vm13, %v192_v46, %v209_v55  ;;  %v203_v38 = vsel %vm197_vm12, %v200_v17, %v202_v56  ;;  %v3082_v29 = vmul.u32.u64.low %v2921_v62, %v207_v48  ;;  %v3083_v40 = vmul.u32.u64.high %v2921_v62, %v207_v48, %v3082_v29 }
  0xb5   :  { %4107 = vst [vmem:[#allocation15_spill] sm:$0xff] %v3045_v15  ;;  %4108 = vst [vmem:[#allocation16_spill] sm:$0xff] %v3057_v34  ;;  %v3061_v42 = vshrl.u32 %v4075_v9, %v3045_v15  ;;  %v211_v25 = vsel %vm197_vm12, %v208_v39, %v210_v16  ;;  %v3088_v4 = vshrl.u32 %v4075_v9, %v3002_v5  ;;  %v3090_v21 = vshrl.u32 %v488_v13, 5 }
  0xb6   :  { %v3093_v1 = vmul.u32.u64.low %v2921_v62, %v211_v25  ;;  %v3094_v46 = vmul.u32.u64.high %v2921_v62, %v211_v25, %v3093_v1  ;;  %v4110_v56 = vmov 683565275   ;;  %v4111_v19 = vmov 2475754826  }
  0xb7   :  { %4109 = vst [vmem:[#allocation17_spill] sm:$0xff] %v3061_v42  ;;  %v285_v17 = vshll.u32 %v4110_v56, %v2906_v43  ;;  %v286_v39 = vshrl.u32 %v4111_v19, %v2915_v59  ;;  %v288_v48 = vshll.u32 %v4111_v19, %v2906_v43  ;;  %v4112_v55 = vmov 2131351028  }
  0xb8   :  { %v289_v16 = vshrl.u32 %v4112_v55, %v2915_v59  ;;  %v3105_v9 = vsub.s32 32, %v3073_v33  ;;  %v219_v13 = vmul.u32 %v2921_v62, %v203_v38  ;;  %v291_v1 = vshll.u32 %v4112_v55, %v2906_v43 }
  0xb9   :  { %v4113_v25 = vmov 2102212464   ;;  %v222_v32 = vadd.s32 1, %v3083_v40  ;;  %v287_v31 = vor.u32 %v286_v39, %v285_v17  ;;  %vm302_vm14 = vcmp.lt.s32.totalorder %v2951_v18, 3 }
  0xba   :  { %v292_v7 = vshrl.u32 %v4113_v25, %v2915_v59  ;;  %v290_v34 = vor.u32 %v289_v16, %v288_v48  ;;  %vm221_vm15 = vc.u32 %v3094_v46, %v3082_v29  ;;  %vm300_vm1 = vcmp.lt.s32.totalorder %v2951_v18, 1 }
  0xbb   :  { %v314_v62 = vsel %vm302_vm14, %v2975_v41, %v313_v53  ;;  %v223_v43 = vsel %vm221_vm15, %v222_v32, %v3083_v40  ;;  %v284_v38 = vshrl.u32 %v4110_v56, %v2915_v59  ;;  %vm301_vm2 = vcmp.lt.s32.totalorder %v2951_v18, 2 }
  0xbc   :  { %v293_v42 = vor.u32 %v292_v7, %v291_v1  ;;  %v308_v17 = vsel %vm300_vm1, %v287_v31, %v290_v34  ;;  %v224_v39 = vadd.s32 %v223_v43, %v219_v13  ;;  %v4114_v1 = vmov 920167782  }
  0xbd   :  { %v503_v6 = vshrl.u32 %v4114_v1, %v3105_v9  ;;  %v304_v41 = vsel %vm300_vm1, %v284_v38, %v287_v31  ;;  %v4089_v38 = vand.u32 2147483647, %v2882_v0  ;;  %vm407_vm3 = vcmp.lt.s32.totalorder %v2971_v35, 4 }
  0xbe   :  { %v305_v48 = vsel %vm303_vm6, %v293_v42, 2102212464  ;;  %v310_v7 = vsel %vm302_vm14, %v293_v42, %v309_v37  ;;  %v312_v16 = vsel %vm300_vm1, %v290_v34, %v293_v42  ;;  %v225_v53 = vadd.s32 536870912, %v224_v39 }
  0xbf   :  { %v311_v32 = vsel %vm301_vm2, %v308_v17, %v310_v7  ;;  %v315_v59 = vsel %vm301_vm2, %v312_v16, %v314_v62  ;;  %v306_v40 = vsel %vm302_vm14, %v290_v34, %v305_v48  ;;  %v401_v37 = vshll.u32 %v4114_v1, %v2973_v36 }
  0xc0   :  { %v3137_v13 = vmul.u32.u64.low %v2931_v3, %v315_v59  ;;  %v3138_v43 = vmul.u32.u64.high %v2931_v3, %v315_v59, %v3137_v13  ;;  %v3143_v42 = vmul.u32.u64.low %v2931_v3, %v311_v32  ;;  %v3144_v31 = vmul.u32.u64.high %v2931_v3, %v311_v32, %v3143_v42 }
  0xc1   :  { %v400_v62 = vor.u32 %v399_v8, %v3028_v50  ;;  %v502_v34 = vshll.u32 %v4113_v25, %v3073_v33  ;;  %v226_v17 = vshrl.u32 %v225_v53, 30  ;;  %v403_v48 = vor.u32 %v3088_v4, %v401_v37 }
  0xc2   :  { %v3155_v7 = vshll.u32 %v4114_v1, %v3073_v33  ;;  %vm511_vm4 = vcmp.lt.s32.totalorder %v3090_v21, 4  ;;  %v307_v16 = vsel %vm301_vm2, %v304_v41, %v306_v40  ;;  %v4115_v8 = vmov 1326507024  }
  0xc3   :  { %v3160_v32 = vor.u32 %v503_v6, %v502_v34  ;;  %v3164_v50 = vshrl.u32 %v4115_v8, %v3105_v9  ;;  %v227_v59 = vshll.u32 %v226_v17, 30  ;;  %vm325_vm5 = vc.u32 %v3138_v43, %v3143_v42 }
  0xc4   :  { %v326_v4 = vadd.s32 1, %v3144_v31  ;;  %v390_v53 = vshrl.u32 %v4111_v19, %v3002_v5  ;;  %v393_v13 = vshrl.u32 %v4112_v55, %v3002_v5  ;;  %v396_v6 = vshrl.u32 %v4113_v25, %v3002_v5 }
  0xc5   :  { %v607_v18 = vshrl.u32 %v4114_v1, %v2929_v2  ;;  %vm166_vm6 = vcmp.lt.s32.totalorder %v2877_v54, 0  ;;  %v3178_v41 = vsub.s32 %v224_v39, %v227_v59  ;;  %v323_v40 = vmul.u32 %v2931_v3, %v307_v16 }
  0xc6   :  { %v379_v37 = vand.u32 8388607, %v4089_v38  ;;  %v327_v34 = vsel %vm325_vm5, %v326_v4, %v3144_v31  ;;  %v389_v8 = vshll.u32 %v4110_v56, %v2973_v36  ;;  %v392_v23 = vshll.u32 %v4111_v19, %v2973_v36 }
  0xc7   :  { %v395_v58 = vshll.u32 %v4112_v55, %v2973_v36  ;;  %v413_v39 = vsel %vm407_vm3, %v400_v62, 920167782  ;;  %v3193_v59 = vshrl.u32 %v2910_v57, 5  ;;  %v230_v3 = vsub.s32 0, %v3178_v41 }
  0xc8   :  { %v328_v16 = vadd.s32 %v327_v34, %v323_v40  ;;  %v606_v31 = vshll.u32 %v4113_v25, %v2918_v60  ;;  %v4116_v4 = vand.u32 2147483647, %v2877_v54  ;;  %v391_v15 = vor.u32 %v390_v53, %v389_v8 }
  0xc9   :  { %v394_v36 = vor.u32 %v393_v13, %v392_v23  ;;  %v397_v51 = vor.u32 %v396_v6, %v395_v58  ;;  %v417_v20 = vsel %vm407_vm3, %v403_v48, 1326507024  ;;  %v507_v57 = vor.u32 %v3164_v50, %v3155_v7 }
  0xca   :  { %vm3200_vm7 = vcmp.le.f32.partialorder %v4116_v4, 0.7853982  ;;  %v2525_v40 = vmin.u32 %v230_v3, %v3178_v41  ;;  %v380_v34 = vor.u32 8388608, %v379_v37  ;;  %v3212_v49 = vsel %vm511_vm4, %v3160_v32, 920167782 }
  0xcb   :  { %v3214_v4 = vor.u32 %v607_v18, %v606_v31  ;;  %v250_v44 = vsub.s32 4, %v226_v17  ;;  %v329_v53 = vadd.s32 536870912, %v328_v16  ;;  %vm615_vm8 = vcmp.lt.s32.totalorder %v3193_v59, 4 }
  0xcc   :  { %v710_v58 = vshll.u32 %v4113_v25, %v2948_v14  ;;  %v232_v23 = vclz %v2525_v40  ;;  %vm404_vm9 = vcmp.lt.s32.totalorder %v2971_v35, 1  ;;  %vm406_vm10 = vcmp.lt.s32.totalorder %v2971_v35, 3 }
  0xcd   :  { %v3221_v48 = vshrl.u32 %v329_v53, 30  ;;  %vm405_vm11 = vcmp.lt.s32.totalorder %v2971_v35, 2  ;;  %v412_v7 = vsel %vm404_vm9, %v391_v15, %v394_v36  ;;  %v414_v50 = vsel %vm406_vm10, %v397_v51, %v413_v39 }
  0xce   :  { %v2526_v13 = vadd.s32 4294967294, %v232_v23  ;;  %v416_v6 = vsel %vm404_vm9, %v394_v36, %v397_v51  ;;  %v418_v18 = vsel %vm406_vm10, %v400_v62, %v417_v20  ;;  %v420_v37 = vshll.u32 %v380_v34, 8 }
  0xcf   :  { %v711_v8 = vshrl.u32 %v4114_v1, %v2969_v26  ;;  %v251_v3 = vsel %vm166_vm6, %v250_v44, %v226_v17  ;;  %v331_v31 = vshll.u32 %v3221_v48, 30  ;;  %v419_v40 = vsel %vm405_vm11, %v416_v6, %v418_v18 }
  0xd0   :  { %vm2527_vm12 = vcmp.lt.s32.totalorder %v2526_v13, 0  ;;  %v409_v39 = vsel %vm407_vm3, %v397_v51, 2102212464  ;;  %v3241_v53 = vmul.u32.u64.low %v420_v37, %v419_v40  ;;  %v3242_v23 = vmul.u32.u64.high %v420_v37, %v419_v40, %v3241_v53 }
  0xd1   :  { %v235_v20 = vsel %vm2527_vm12, 0, %v2526_v13  ;;  %v3244_v62 = vsub.s32 %v328_v16, %v331_v31  ;;  %v388_v34 = vshrl.u32 %v4110_v56, %v3002_v5  ;;  %v415_v44 = vsel %vm405_vm11, %v412_v7, %v414_v50  ;;  %v2150_v31 = vpop.xlane.xlu1 %2149 }
  0xd2   :  { %v220_v17 = vadd.s32 %v3082_v29, %v3094_v46  ;;  %v236_v6 = vsub.s32 32, %v235_v20  ;;  %v240_v18 = vsub.s32 4294967266, %v235_v20  ;;  %v253_v51 = vsel %vm3200_vm7, 0, %v251_v3 }
  0xd3   :  { %v237_v40 = vshll.u32 %v3178_v41, %v235_v20  ;;  %vm270_vm13 = vcmp.lt.s32.totalorder %v2872_v47, 0  ;;  %v334_v16 = vsub.s32 0, %v3244_v62  ;;  %v408_v5 = vsel %vm404_vm9, %v388_v34, %v391_v15 }
  0xd4   :  { %v410_v7 = vsel %vm406_vm10, %v394_v36, %v409_v39  ;;  %v238_v50 = vshrl.u32 %v220_v17, %v236_v6  ;;  %v241_v13 = vadd.s32 127, %v240_v18  ;;  %v3267_v3 = vsel %vm511_vm4, %v507_v57, 1326507024 }
  0xd5   :  { %v3261_v29 = vmul.u32.u64.low %v420_v37, %v415_v44  ;;  %v3262_v46 = vmul.u32.u64.high %v420_v37, %v415_v44, %v3261_v29  ;;  %v3272_v41 = vsel %vm615_vm8, %v3214_v4, 920167782  ;;  %v3275_v15 = vshrl.u32 %v2945_v12, 5 }
  0xd6   :  { %v2529_v36 = vmin.u32 %v334_v16, %v3244_v62  ;;  %v4119_v39 = vor.u32 %v2943_v11, %v2939_v30  ;;  %v3285_v57 = vor.u32 %v711_v8, %v710_v58  ;;  %v239_v20 = vor.u32 %v238_v50, %v237_v40 }
  0xd7   :  { %v242_v34 = vshll.u32 %v241_v13, 23  ;;  %v3288_v44 = vshrl.u32 %v2990_v52, 5  ;;  %v257_v17 = vadd.s32 3, %v253_v51  ;;  %v411_v6 = vsel %vm405_vm11, %v408_v5, %v410_v7 }
  0xd8   :  { %v3283_v53 = vsel %vm615_vm8, %v4119_v39, 1326507024  ;;  %v336_v12 = vclz %v2529_v36  ;;  %v354_v16 = vsub.s32 4, %v3221_v48  ;;  %vm2151_vm14 = vcmp.eq.f32.partialorder %v2846_v28, %v2150_v31 }
  0xd9   :  { %v243_v18 = vor.u32 4788187, %v242_v34  ;;  %vm429_vm15 = vc.u32 %v3242_v23, %v3261_v29  ;;  %v324_v30 = vadd.s32 %v3143_v42, %v3138_v43  ;;  %v430_v52 = vadd.s32 1, %v3262_v46 }
  0xda   :  { %v2530_v11 = vadd.s32 4294967294, %v336_v12  ;;  %v476_v58 = vand.u32 2147483647, %v2894_v22  ;;  %v246_v40 = vcvt.s32.f32 %v239_v20  ;;  %v3300_v35 = vand.u32 3, %v253_v51 }
  0xdb   :  { %v244_v8 = vand.u32 2147483647, %v243_v18  ;;  %v4120_v5 = vand.u32 2147483647, %v2872_v47  ;;  %v427_v28 = vmul.u32 %v420_v37, %v411_v6  ;;  %v3308_v50 = vand.u32 3, %v257_v17 }
  0xdc   :  { %vm2531_vm2 = vcmp.lt.s32.totalorder %v2530_v11, 0  ;;  %v2152_v43 = vsel %vm2151_vm14, %v2924_v63, 16  ;;  %v431_v42 = vsel %vm429_vm15, %v430_v52, %v3262_v46  ;;  %v355_v51 = vsel %vm270_vm13, %v354_v16, %v3221_v48 }
  0xdd   :  { %vm3304_vm1 = vcmp.le.f32.partialorder %v4120_v5, 0.7853982  ;;  %v247_v13 = vmul.f32 %v246_v40, %v244_v8  ;;  %v339_v36 = vsel %vm2531_vm2, 0, %v2530_v11  ;;  %v432_v31 = vadd.s32 %v431_v42, %v427_v28 }
  0xde   :  { %v340_v39 = vsub.s32 32, %v339_v36  ;;  %v344_v20 = vsub.s32 4294967266, %v339_v36  ;;  %v483_v34 = vand.u32 8388607, %v476_v58  ;;  %v494_v37 = vshrl.u32 %v4111_v19, %v3105_v9 }
  0xdf   :  { %v248_v17 = vxor.u32 2147483648, %v247_v13  ;;  %v433_v12 = vadd.s32 536870912, %v432_v31  ;;  %v497_v46 = vshrl.u32 %v4112_v55, %v3105_v9  ;;  %v500_v6 = vshrl.u32 %v4113_v25, %v3105_v9 }
  0xe0   :  { %v341_v18 = vshll.u32 %v3244_v62, %v339_v36  ;;  %v342_v48 = vshrl.u32 %v324_v30, %v340_v39  ;;  %v345_v16 = vadd.s32 127, %v344_v20  ;;  %v499_v11 = vshll.u32 %v4112_v55, %v3073_v33 }
  0xe1   :  { %v249_v52 = vsel %vm166_vm6, %v248_v17, %v247_v13  ;;  %v434_v8 = vshrl.u32 %v433_v12, 30  ;;  %v493_v40 = vshll.u32 %v4110_v56, %v3073_v33  ;;  %v496_v5 = vshll.u32 %v4111_v19, %v3073_v33 }
  0xe2   :  { %v252_v28 = vsel %vm3200_vm7, %v2877_v54, %v249_v52  ;;  %v343_v62 = vor.u32 %v342_v48, %v341_v18  ;;  %v346_v30 = vshll.u32 %v345_v16, 23  ;;  %v501_v42 = vor.u32 %v500_v6, %v499_v11 }
  0xe3   :  { %2703 = vcosq.f32 %v252_v28  ;;  %vm374_vm3 = vcmp.lt.s32.totalorder %v2882_v0, 0  ;;  %v435_v36 = vshll.u32 %v434_v8, 30  ;;  %v495_v39 = vor.u32 %v494_v37, %v493_v40 }
  0xe4   :  { %v498_v13 = vor.u32 %v497_v46, %v496_v5  ;;  %2705 = vsinq.f32 %v252_v28  ;;  %v347_v20 = vor.u32 4788187, %v346_v30  ;;  %v357_v17 = vsel %vm3304_vm1, 0, %v355_v51 }
  0xe5   :  { %v3339_v33 = vsel %vm2147_vm0, %v2152_v43, 2147483647  ;;  %v3341_v12 = vsub.s32 %v432_v31, %v435_v36  ;;  %v484_v38 = vor.u32 8388608, %v483_v34  ;;  %v492_v6 = vshrl.u32 %v4110_v56, %v3105_v9 }
  0xe6   :  { %vm508_vm5 = vcmp.lt.s32.totalorder %v3090_v21, 1  ;;  %v348_v18 = vand.u32 2147483647, %v347_v20  ;;  %v350_v48 = vcvt.s32.f32 %v343_v62  ;;  %vm510_vm6 = vcmp.lt.s32.totalorder %v3090_v21, 3 }
  0xe7   :  { %v513_v37 = vsel %vm511_vm4, %v501_v42, 2102212464  ;;  %v4123_v51 = vand.u32 2147483647, %v2882_v0  ;;  %v438_v31 = vsub.s32 0, %v3341_v12  ;;  %v516_v34 = vsel %vm508_vm5, %v495_v39, %v498_v13 }
  0xe8   :  { %v518_v9 = vsel %vm510_vm6, %v501_v42, %v3212_v49  ;;  %v520_v46 = vsel %vm508_vm5, %v498_v13, %v501_v42  ;;  %v351_v16 = vmul.f32 %v350_v48, %v348_v18  ;;  %v458_v11 = vsub.s32 4, %v434_v8 }
  0xe9   :  { %vm3351_vm7 = vcmp.le.f32.partialorder %v4123_v51, 0.7853982  ;;  %vm509_vm9 = vcmp.lt.s32.totalorder %v3090_v21, 2  ;;  %v522_v52 = vsel %vm510_vm6, %v3160_v32, %v3267_v3  ;;  %v2533_v40 = vmin.u32 %v438_v31, %v3341_v12 }
  0xea   :  { %v512_v5 = vsel %vm508_vm5, %v492_v6, %v495_v39  ;;  %v514_v28 = vsel %vm510_vm6, %v498_v13, %v513_v37  ;;  %v524_v62 = vshll.u32 %v484_v38, 8  ;;  %vm1094_vm4 = vcmp.eq.s32.totalorder %v3300_v35, 2 }
  0xeb   :  { %v352_v30 = vxor.u32 2147483648, %v351_v16  ;;  %v361_v36 = vadd.s32 3, %v357_v17  ;;  %v519_v49 = vsel %vm509_vm9, %v516_v34, %v518_v9  ;;  %v523_v42 = vsel %vm509_vm9, %v520_v46, %v522_v52 }
  0xec   :  { %vm1091_vm10 = vcmp.eq.s32.totalorder %v3300_v35, 0  ;;  %v440_v20 = vclz %v2533_v40  ;;  %v3367_v18 = vmul.u32.u64.low %v524_v62, %v523_v42  ;;  %v3368_v32 = vmul.u32.u64.high %v524_v62, %v523_v42, %v3367_v18 }
  0xed   :  { %v2155_v3 = vshra.s32 %v3339_v33, 16  ;;  %vm1090_vm11 = vcmp.lt.s32.totalorder %v3300_v35, 2  ;;  %vm1822_vm12 = vcmask 64512   ;;  %vm259_vm14 = vcmp.lt.s32.totalorder %v3308_v50, 2 }
  0xee   :  { %v353_v39 = vsel %vm270_vm13, %v352_v30, %v351_v16  ;;  %v459_v13 = vsel %vm374_vm3, %v458_v11, %v434_v8  ;;  %v515_v38 = vsel %vm509_vm9, %v512_v5, %v514_v28  ;;  %vm256_vm15 = vweird.f32 %v2877_v54 }
  0xef   :  { %v356_v6 = vsel %vm3304_vm1, %v2872_v47, %v353_v39  ;;  %v2534_v48 = vadd.s32 4294967294, %v440_v20  ;;  %v3383_v37 = vmul.u32.u64.low %v524_v62, %v519_v49  ;;  %v3384_v51 = vmul.u32.u64.high %v524_v62, %v519_v49, %v3383_v37 }
  0xf0   :  { %vm260_vm2 = vcmp.eq.s32.totalorder %v3308_v50, 0  ;;  %vm263_vm13 = vcmp.eq.s32.totalorder %v3308_v50, 2  ;;  %2707 = vcosq.f32 %v356_v6  ;;  %v3389_v8 = vcvt.s32.f32 %v2155_v3  ;;  %v2704_v7 = vpop.eup %2703 }
  0xf1   :  { %2709 = vsinq.f32 %v356_v6  ;;  %v3391_v21 = vand.u32 3, %v357_v17  ;;  %v3393_v31 = vand.u32 3, %v361_v36  ;;  %vm2535_vm5 = vcmp.lt.s32.totalorder %v2534_v48, 0  ;;  %v2706_v11 = vpop.eup %2705 }
  0xf2   :  { %v428_v34 = vadd.s32 %v3261_v29, %v3242_v23  ;;  %v443_v9 = vsel %vm2535_vm5, 0, %v2534_v48  ;;  %v3399_v46 = vsel %vm3351_vm7, 0, %v459_v13  ;;  %v531_v16 = vmul.u32 %v524_v62, %v515_v38  ;;  %2158 = vmin.xlane.f32.xlu0 %v3389_v8 }
  0xf3   :  { %v264_v52 = vxor.u32 2147483648, %v2704_v7  ;;  %v444_v40 = vsub.s32 32, %v443_v9  ;;  %v448_v17 = vsub.s32 4294967266, %v443_v9  ;;  %vm533_vm1 = vc.u32 %v3368_v32, %v3383_v37 }
  0xf4   :  { %v261_v5 = vxor.u32 2147483648, %v2706_v11  ;;  %v445_v28 = vshll.u32 %v3341_v12, %v443_v9  ;;  %v534_v23 = vadd.s32 1, %v3384_v51  ;;  %v580_v29 = vand.u32 2147483647, %v2888_v10 }
  0xf5   :  { %v1096_v30 = vsel %vm1094_vm4, %v264_v52, %v2706_v11  ;;  %v265_v62 = vsel %vm263_vm13, %v264_v52, %v2706_v11  ;;  %v446_v36 = vshrl.u32 %v428_v34, %v444_v40  ;;  %v449_v49 = vadd.s32 127, %v448_v17 }
  0xf6   :  { %v1093_v42 = vsel %vm1091_vm10, %v2704_v7, %v261_v5  ;;  %v262_v20 = vsel %vm260_vm2, %v2704_v7, %v261_v5  ;;  %v535_v12 = vsel %vm533_vm1, %v534_v23, %v3384_v51  ;;  %v598_v18 = vshrl.u32 %v4111_v19, %v2929_v2 }
  0xf7   :  { %v1097_v3 = vsel %vm1090_vm11, %v1093_v42, %v1096_v30  ;;  %v266_v39 = vsel %vm259_vm14, %v262_v20, %v265_v62  ;;  %v447_v13 = vor.u32 %v446_v36, %v445_v28  ;;  %v450_v38 = vshll.u32 %v449_v49, 23 }
  0xf8   :  { %v1098_v6 = vsel %vm256_vm15, nan, %v1097_v3  ;;  %v267_v48 = vsel %vm256_vm15, nan, %v266_v39  ;;  %vm1194_vm6 = vcmp.eq.s32.totalorder %v3391_v21, 0  ;;  %v536_v51 = vadd.s32 %v535_v12, %v531_v16 }
  0xf9   :  { %v597_v7 = vshll.u32 %v4110_v56, %v2918_v60  ;;  %2627 = vmatprep.mubr.msk.f32.mxu0 %vm1822_vm12, %v1098_v6  ;;  %2641 = vmatprep.mubr.msk.f32.mxu1 %vm1822_vm12, %v267_v48  ;;  %vm1193_vm9 = vcmp.lt.s32.totalorder %v3391_v21, 2  ;;  %v451_v35 = vor.u32 4788187, %v450_v38  ;;  %v587_v50 = vand.u32 8388607, %v580_v29 }
  0xfa   :  { %v600_v54 = vshll.u32 %v4111_v19, %v2918_v60  ;;  %v601_v34 = vshrl.u32 %v4112_v55, %v2929_v2  ;;  %vm360_vm4 = vweird.f32 %v2872_v47  ;;  %v537_v9 = vadd.s32 536870912, %v536_v51 }
  0xfb   :  { %v599_v16 = vor.u32 %v598_v18, %v597_v7  ;;  %v603_v11 = vshll.u32 %v4112_v55, %v2918_v60  ;;  %v604_v52 = vshrl.u32 %v4113_v25, %v2929_v2  ;;  %v452_v40 = vand.u32 2147483647, %v451_v35 }
  0xfc   :  { %v454_v17 = vcvt.s32.f32 %v447_v13  ;;  %v602_v5 = vor.u32 %v601_v34, %v600_v54  ;;  %vm614_vm10 = vcmp.lt.s32.totalorder %v3193_v59, 3  ;;  %vm1197_vm11 = vcmp.eq.s32.totalorder %v3391_v21, 2 }
  0xfd   :  { %v3445_v28 = vshrl.u32 %v537_v9, 30  ;;  %v605_v23 = vor.u32 %v604_v52, %v603_v11  ;;  %v626_v30 = vsel %vm614_vm10, %v3214_v4, %v3283_v53  ;;  %v2708_v62 = vpop.eup %2707  ;;  %vm363_vm14 = vcmp.lt.s32.totalorder %v3393_v31, 2 }
  0xfe   :  { %vm364_vm15 = vcmp.eq.s32.totalorder %v3393_v31, 0  ;;  %vm367_vm2 = vcmp.eq.s32.totalorder %v3393_v31, 2  ;;  %v455_v60 = vmul.f32 %v454_v17, %v452_v40  ;;  %v2710_v36 = vpop.eup %2709  ;;  %v368_v49 = vxor.u32 2147483648, %v2708_v62 }
  0xff   :  { %v465_v42 = vadd.s32 3, %v3399_v46  ;;  %v539_v20 = vshll.u32 %v3445_v28, 30  ;;  %vm612_vm13 = vcmp.lt.s32.totalorder %v3193_v59, 1  ;;  %vm719_vm5 = vcmp.lt.s32.totalorder %v3275_v15, 4 }
 0x100   :  { %v365_v12 = vxor.u32 2147483648, %v2710_v36  ;;  %v456_v4 = vxor.u32 2147483648, %v455_v60  ;;  %v588_v53 = vor.u32 8388608, %v587_v50  ;;  %v620_v18 = vsel %vm612_vm13, %v599_v16, %v602_v5 }
 0x101   :  { %v1199_v3 = vsel %vm1197_vm11, %v368_v49, %v2710_v36  ;;  %v369_v39 = vsel %vm367_vm2, %v368_v49, %v2710_v36  ;;  %v3462_v13 = vsub.s32 %v536_v51, %v539_v20  ;;  %v617_v38 = vsel %vm615_vm8, %v605_v23, 2102212464 }
 0x102   :  { %v1196_v6 = vsel %vm1194_vm6, %v2708_v62, %v365_v12  ;;  %v366_v48 = vsel %vm364_vm15, %v2708_v62, %v365_v12  ;;  %v457_v7 = vsel %vm374_vm3, %v456_v4, %v455_v60  ;;  %v622_v35 = vsel %vm614_vm10, %v605_v23, %v3272_v41 }
 0x103   :  { %v1200_v51 = vsel %vm1193_vm9, %v1196_v6, %v1199_v3  ;;  %v370_v50 = vsel %vm363_vm14, %v366_v48, %v369_v39  ;;  %v460_v54 = vsel %vm3351_vm7, %v2882_v0, %v457_v7  ;;  %v542_v34 = vsub.s32 0, %v3462_v13 }
 0x104   :  { %v1201_v9 = vsel %vm360_vm4, nan, %v1200_v51  ;;  %v371_v11 = vsel %vm360_vm4, nan, %v370_v50  ;;  %2711 = vcosq.f32 %v460_v54  ;;  %v596_v41 = vshrl.u32 %v4110_v56, %v2929_v2 }
 0x105   :  { %v815_v21 = vshrl.u32 %v4114_v1, %v3011_v27  ;;  %2628 = vmatmul.mubr.msk.f32.vlgmr.msra.gmra.mxu0 %vm1822_vm12, %v1201_v9  ;;  %2642 = vmatmul.mubr.msk.f32.vlgmr.msra.gmra.mxu1 %vm1822_vm12, %v371_v11  ;;  %2713 = vsinq.f32 %v460_v54  ;;  %v2537_v43 = vmin.u32 %v542_v34, %v3462_v13  ;;  %vm613_vm8 = vcmp.lt.s32.totalorder %v3193_v59, 2 }
 0x106   :  { %v616_v47 = vsel %vm612_vm13, %v596_v41, %v599_v16  ;;  %v618_v31 = vsel %vm614_vm10, %v602_v5, %v617_v38  ;;  %v623_v52 = vsel %vm613_vm8, %v620_v18, %v622_v35  ;;  %v628_v2 = vshll.u32 %v588_v53, 8  ;;  %v4126_v18 = vld [vmem:[#allocation10_spill] sm:$0xff] }
 0x107   :  { %v814_v40 = vshll.u32 %v4113_v25, %v2997_v61  ;;  %v3502_v17 = vand.u32 3, %v3399_v46  ;;  %v544_v62 = vclz %v2537_v43  ;;  %v624_v60 = vsel %vm612_vm13, %v602_v5, %v605_v23 }
 0x108   :  { %v3506_v36 = vand.u32 3, %v465_v42  ;;  %v627_v49 = vsel %vm613_vm8, %v624_v60, %v626_v30  ;;  %v3508_v20 = vmul.u32.u64.low %v628_v2, %v623_v52  ;;  %v3509_v16 = vmul.u32.u64.high %v628_v2, %v623_v52, %v3508_v20 }
 0x109   :  { %v3514_v12 = vsel %vm719_vm5, %v3285_v57, 920167782  ;;  %v2538_v4 = vadd.s32 4294967294, %v544_v62  ;;  %v619_v53 = vsel %vm613_vm8, %v616_v47, %v618_v31  ;;  %v684_v46 = vand.u32 2147483647, %v2896_v24 }
 0x10a   :  { %v4127_v3 = vor.u32 %v2983_v45, %v4126_v18  ;;  %v3524_v5 = vor.u32 %v815_v21, %v814_v40  ;;  %v3526_v23 = vmul.u32.u64.low %v628_v2, %v627_v49  ;;  %v3527_v30 = vmul.u32.u64.high %v628_v2, %v627_v49, %v3526_v23 }
 0x10b   :  { %vm1300_vm3 = vcmp.eq.s32.totalorder %v3502_v17, 2  ;;  %vm478_vm7 = vcmp.lt.s32.totalorder %v2894_v22, 0  ;;  %v532_v42 = vadd.s32 %v3383_v37, %v3368_v32  ;;  %vm2539_vm1 = vcmp.lt.s32.totalorder %v2538_v4, 0 }
 0x10c   :  { %v3522_v59 = vsel %vm719_vm5, %v4127_v3, 1326507024  ;;  %vm1297_vm6 = vcmp.eq.s32.totalorder %v3502_v17, 0  ;;  %vm468_vm9 = vcmp.eq.s32.totalorder %v3506_v36, 0  ;;  %v547_v45 = vsel %vm2539_vm1, 0, %v2538_v4 }
 0x10d   :  { %v562_v39 = vsub.s32 4, %v3445_v28  ;;  %v635_v38 = vmul.u32 %v628_v2, %v619_v53  ;;  %v638_v6 = vadd.s32 1, %v3509_v16  ;;  %vm1296_vm4 = vcmp.lt.s32.totalorder %v3502_v17, 2 }
 0x10e   :  { %vm467_vm10 = vcmp.lt.s32.totalorder %v3506_v36, 2  ;;  %v548_v48 = vsub.s32 32, %v547_v45  ;;  %v552_v7 = vsub.s32 4294967266, %v547_v45  ;;  %v691_v32 = vand.u32 8388607, %v684_v46 }
 0x10f   :  { %v702_v37 = vshrl.u32 %v4111_v19, %v2969_v26  ;;  %vm464_vm11 = vweird.f32 %v2882_v0  ;;  %v3545_v35 = vadd.s32 %v3508_v20, %v3527_v30  ;;  %vm637_vm14 = vc.u32 %v3527_v30, %v3508_v20 }
 0x110   :  { %v701_v51 = vshll.u32 %v4110_v56, %v2948_v14  ;;  %v705_v50 = vshrl.u32 %v4112_v55, %v2969_v26  ;;  %v549_v54 = vshll.u32 %v3462_v13, %v547_v45  ;;  %v550_v34 = vshrl.u32 %v532_v42, %v548_v48 }
 0x111   :  { %v553_v9 = vadd.s32 127, %v552_v7  ;;  %v639_v11 = vsel %vm637_vm14, %v638_v6, %v3509_v16  ;;  %vm471_vm15 = vcmp.eq.s32.totalorder %v3506_v36, 2  ;;  %v704_v21 = vshll.u32 %v4111_v19, %v2948_v14  ;;  %v2712_v47 = vpop.eup %2711 }
 0x112   :  { %v640_v41 = vadd.s32 %v639_v11, %v635_v38  ;;  %v708_v43 = vshrl.u32 %v4113_v25, %v2969_v26  ;;  %vm3561_vm2 = vcmp.le.f32.partialorder %v476_v58, 0.7853982  ;;  %v551_v13 = vor.u32 %v550_v34, %v549_v54  ;;  %v2714_v62 = vpop.eup %2713 }
 0x113   :  { %v554_v52 = vshll.u32 %v553_v9, 23  ;;  %v563_v2 = vsel %vm478_vm7, %v562_v39, %v3445_v28  ;;  %v703_v40 = vor.u32 %v702_v37, %v701_v51  ;;  %v472_v60 = vxor.u32 2147483648, %v2712_v47 }
 0x114   :  { %v641_v49 = vadd.s32 536870912, %v640_v41  ;;  %v706_v20 = vor.u32 %v705_v50, %v704_v21  ;;  %v707_v16 = vshll.u32 %v4112_v55, %v2948_v14  ;;  %v469_v4 = vxor.u32 2147483648, %v2714_v62 }
 0x115   :  { %v555_v53 = vor.u32 4788187, %v554_v52  ;;  %v692_v58 = vor.u32 8388608, %v691_v32  ;;  %vm716_vm13 = vcmp.lt.s32.totalorder %v3275_v15, 1  ;;  %v1302_v18 = vsel %vm1300_vm3, %v472_v60, %v2714_v62 }
 0x116   :  { %v473_v3 = vsel %vm471_vm15, %v472_v60, %v2714_v62  ;;  %v3575_v28 = vshrl.u32 %v641_v49, 30  ;;  %v709_v23 = vor.u32 %v708_v43, %v707_v16  ;;  %v1299_v30 = vsel %vm1297_vm6, %v2712_v47, %v469_v4  ;;  %v4130_v16 = vld [vmem:[#allocation14_spill] sm:$0xff] }
 0x117   :  { %v470_v14 = vsel %vm468_vm9, %v2712_v47, %v469_v4  ;;  %v556_v42 = vand.u32 2147483647, %v555_v53  ;;  %v558_v45 = vcvt.s32.f32 %v551_v13  ;;  %v1303_v39 = vsel %vm1296_vm4, %v1299_v30, %v1302_v18 }
 0x118   :  { %v474_v38 = vsel %vm467_vm10, %v470_v14, %v473_v3  ;;  %v643_v6 = vshll.u32 %v3575_v28, 30  ;;  %v724_v48 = vsel %vm716_vm13, %v703_v40, %v706_v20  ;;  %v1304_v7 = vsel %vm464_vm11, nan, %v1303_v39  ;;  %v4131_v3 = vld [vmem:[#allocation12_spill] sm:$0xff] }
 0x119   :  { %v475_v32 = vsel %vm464_vm11, nan, %v474_v38  ;;  %v559_v37 = vmul.f32 %v558_v45, %v556_v42  ;;  %vm718_vm8 = vcmp.lt.s32.totalorder %v3275_v15, 3  ;;  %2630 = vmatprep.mubr.msk.f32.mxu0 %vm1822_vm12, %v1304_v7  ;;  %vm717_vm3 = vcmp.lt.s32.totalorder %v3275_v15, 2  ;;  %v4134_v15 = vld [vmem:[#allocation15_spill] sm:$0xff]  ;;  %v4135_v39 = vld [vmem:[#allocation8_spill] sm:$0xff] }
 0x11a   :  { %2644 = vmatprep.mubr.msk.f32.mxu1 %vm1822_vm12, %v475_v32  ;;  %v3595_v17 = vsub.s32 %v640_v41, %v643_v6  ;;  %v721_v36 = vsel %vm719_vm5, %v709_v23, 2102212464  ;;  %v726_v51 = vsel %vm718_vm8, %v709_v23, %v3514_v12  ;;  %v728_v54 = vsel %vm716_vm13, %v706_v20, %v709_v23  ;;  %v4132_v23 = vld [vmem:[#allocation11_spill] sm:$0xff] }
 0x11b   :  { %v560_v0 = vxor.u32 2147483648, %v559_v37  ;;  %v727_v50 = vsel %vm717_vm3, %v724_v48, %v726_v51  ;;  %v732_v34 = vshll.u32 %v692_v58, 8  ;;  %v565_v9 = vsel %vm3561_vm2, 0, %v563_v2 }
 0x11c   :  { %v646_v11 = vsub.s32 0, %v3595_v17  ;;  %v700_v41 = vshrl.u32 %v4110_v56, %v2969_v26  ;;  %v730_v12 = vsel %vm718_vm8, %v3285_v57, %v3522_v59  ;;  %v722_v57 = vsel %vm718_vm8, %v706_v20, %v721_v36 }
 0x11d   :  { %v561_v21 = vsel %vm478_vm7, %v560_v0, %v559_v37  ;;  %v731_v43 = vsel %vm717_vm3, %v728_v54, %v730_v12  ;;  %v3620_v47 = vmul.u32.u64.low %v732_v34, %v727_v50  ;;  %v3621_v13 = vmul.u32.u64.high %v732_v34, %v727_v50, %v3620_v47 }
 0x11e   :  { %v564_v52 = vsel %vm3561_vm2, %v2894_v22, %v561_v21  ;;  %v2541_v26 = vmin.u32 %v646_v11, %v3595_v17  ;;  %v720_v2 = vsel %vm716_vm13, %v700_v41, %v703_v40  ;;  %v569_v59 = vadd.s32 3, %v565_v9 }
 0x11f   :  { %2715 = vcosq.f32 %v564_v52  ;;  %v3631_v60 = vmul.u32.u64.low %v732_v34, %v731_v43  ;;  %v3632_v49 = vmul.u32.u64.high %v732_v34, %v731_v43, %v3631_v60  ;;  %vm823_vm5 = vcmp.lt.s32.totalorder %v3288_v44, 4 }
 0x120   :  { %2717 = vsinq.f32 %v564_v52  ;;  %v648_v62 = vclz %v2541_v26  ;;  %v3637_v31 = vshll.u32 %v4113_v25, %v4130_v16  ;;  %v723_v4 = vsel %vm717_vm3, %v720_v2, %v722_v57 }
 0x121   :  { %v742_v40 = vadd.s32 1, %v3621_v13  ;;  %v3645_v20 = vsel %vm823_vm5, %v3524_v5, 920167782  ;;  %v3647_v53 = vand.u32 3, %v565_v9  ;;  %v666_v18 = vsub.s32 4, %v3575_v28 }
 0x122   :  { %v2542_v58 = vadd.s32 4294967294, %v648_v62  ;;  %v4133_v30 = vor.u32 %v4131_v3, %v4132_v23  ;;  %v3657_v42 = vshrl.u32 %v4114_v1, %v4134_v15  ;;  %v3659_v45 = vand.u32 3, %v569_v59 }
 0x123   :  { %v788_v38 = vand.u32 2147483647, %v4135_v39  ;;  %v739_v6 = vmul.u32 %v732_v34, %v723_v4  ;;  %v3663_v48 = vadd.s32 %v3620_v47, %v3632_v49  ;;  %vm741_vm1 = vc.u32 %v3632_v49, %v3620_v47 }
 0x124   :  { %v833_v14 = vsel %vm823_vm5, %v4133_v30, 1326507024  ;;  %vm2543_vm7 = vcmp.lt.s32.totalorder %v2542_v58, 0  ;;  %vm3668_vm6 = vcmp.le.f32.partialorder %v580_v29, 0.7853982  ;;  %vm582_vm9 = vcmp.lt.s32.totalorder %v2888_v10, 0 }
 0x125   :  { %v651_v1 = vsel %vm2543_vm7, 0, %v2542_v58  ;;  %v743_v32 = vsel %vm741_vm1, %v742_v40, %v3621_v13  ;;  %vm1403_vm4 = vcmp.eq.s32.totalorder %v3647_v53, 2  ;;  %v667_v51 = vsel %vm582_vm9, %v666_v18, %v3575_v28 }
 0x126   :  { %v652_v37 = vsub.s32 32, %v651_v1  ;;  %v656_v36 = vsub.s32 4294967266, %v651_v1  ;;  %v744_v0 = vadd.s32 %v743_v32, %v739_v6  ;;  %vm1400_vm10 = vcmp.eq.s32.totalorder %v3647_v53, 0 }
 0x127   :  { %v3681_v29 = vand.u32 8388607, %v788_v38  ;;  %v806_v50 = vshrl.u32 %v4111_v19, %v3011_v27  ;;  %v809_v54 = vshrl.u32 %v4112_v55, %v3011_v27  ;;  %v812_v34 = vshrl.u32 %v4113_v25, %v3011_v27 }
 0x128   :  { %vm1399_vm11 = vcmp.lt.s32.totalorder %v3647_v53, 2  ;;  %vm571_vm14 = vcmp.lt.s32.totalorder %v3659_v45, 2  ;;  %v653_v28 = vshll.u32 %v3595_v17, %v651_v1  ;;  %v654_v9 = vshrl.u32 %v3545_v35, %v652_v37  ;;  %v4138_v53 = vld [vmem:[#allocation13_spill] sm:$0xff] }
 0x129   :  { %v657_v11 = vadd.s32 127, %v656_v36  ;;  %v745_v41 = vadd.s32 536870912, %v744_v0  ;;  %vm568_vm15 = vweird.f32 %v2894_v22  ;;  %vm572_vm2 = vcmp.eq.s32.totalorder %v3659_v45, 0 }
 0x12a   :  { %v805_v12 = vshll.u32 %v4110_v56, %v2997_v61  ;;  %v808_v21 = vshll.u32 %v4111_v19, %v2997_v61  ;;  %v811_v43 = vshll.u32 %v4112_v55, %v2997_v61  ;;  %vm575_vm13 = vcmp.eq.s32.totalorder %v3659_v45, 2 }
 0x12b   :  { %v655_v17 = vor.u32 %v654_v9, %v653_v28  ;;  %v658_v47 = vshll.u32 %v657_v11, 23  ;;  %v3702_v35 = vshrl.u32 %v745_v41, 30  ;;  %v669_v13 = vsel %vm3668_vm6, 0, %v667_v51 }
 0x12c   :  { %v807_v52 = vor.u32 %v806_v50, %v805_v12  ;;  %v810_v26 = vor.u32 %v809_v54, %v808_v21  ;;  %v813_v2 = vor.u32 %v812_v34, %v811_v43  ;;  %v2716_v57 = vpop.eup %2715  ;;  %v796_v60 = vor.u32 8388608, %v3681_v29 }
 0x12d   :  { %v659_v59 = vor.u32 4788187, %v658_v47  ;;  %v747_v62 = vshll.u32 %v3702_v35, 30  ;;  %vm822_vm8 = vcmp.lt.s32.totalorder %v3288_v44, 3  ;;  %v2718_v61 = vpop.eup %2717  ;;  %v576_v49 = vxor.u32 2147483648, %v2716_v57 }
 0x12e   :  { %vm820_vm3 = vcmp.lt.s32.totalorder %v3288_v44, 1  ;;  %vm821_vm7 = vcmp.lt.s32.totalorder %v3288_v44, 2  ;;  %v834_v4 = vsel %vm822_vm8, %v3524_v5, %v833_v14  ;;  %v573_v40 = vxor.u32 2147483648, %v2718_v61 }
 0x12f   :  { %v660_v58 = vand.u32 2147483647, %v659_v59  ;;  %v662_v18 = vcvt.s32.f32 %v655_v17  ;;  %v3714_v3 = vsub.s32 %v744_v0, %v747_v62  ;;  %v1405_v23 = vsel %vm1403_vm4, %v576_v49, %v2718_v61  ;;  %v4139_v62 = vld [vmem:[#allocation9_spill] sm:$0xff] }
 0x130   :  { %v577_v30 = vsel %vm575_vm13, %v576_v49, %v2718_v61  ;;  %v828_v6 = vsel %vm820_vm3, %v807_v52, %v810_v26  ;;  %v830_v1 = vsel %vm822_vm8, %v813_v2, %v3645_v20  ;;  %v1402_v5 = vsel %vm1400_vm10, %v2716_v57, %v573_v40  ;;  %v4141_v61 = vld [vmem:[#allocation16_spill] sm:$0xff] }
 0x131   :  { %v574_v14 = vsel %vm572_vm2, %v2716_v57, %v573_v40  ;;  %v663_v32 = vmul.f32 %v662_v18, %v660_v58  ;;  %v750_v37 = vsub.s32 0, %v3714_v3  ;;  %v1406_v36 = vsel %vm1399_vm11, %v1402_v5, %v1405_v23 }
 0x132   :  { %v578_v51 = vsel %vm571_vm14, %v574_v14, %v577_v30  ;;  %v825_v0 = vsel %vm823_vm5, %v813_v2, 2102212464  ;;  %v832_v20 = vsel %vm820_vm3, %v810_v26, %v813_v2  ;;  %v1407_v29 = vsel %vm568_vm15, nan, %v1406_v36 }
 0x133   :  { %v579_v50 = vsel %vm568_vm15, nan, %v578_v51  ;;  %v664_v54 = vxor.u32 2147483648, %v663_v32  ;;  %v2545_v34 = vmin.u32 %v750_v37, %v3714_v3  ;;  %v3744_v28 = vshrl.u32 %v4138_v53, 5  ;;  %2631 = vmatmul.mubr.msk.f32.gmra.mxu0 %vm1822_vm12, %v1407_v29 }
 0x134   :  { %v3748_v45 = vor.u32 %v3657_v42, %v3637_v31  ;;  %2645 = vmatmul.mubr.msk.f32.gmra.mxu1 %vm1822_vm12, %v579_v50  ;;  %v804_v9 = vshrl.u32 %v4110_v56, %v3011_v27  ;;  %v831_v22 = vsel %vm821_vm7, %v828_v6, %v830_v1  ;;  %v835_v12 = vsel %vm821_vm7, %v832_v20, %v834_v4 }
 0x135   :  { %v665_v11 = vsel %vm582_vm9, %v664_v54, %v663_v32  ;;  %v752_v41 = vclz %v2545_v34  ;;  %v836_v21 = vshll.u32 %v796_v60, 8  ;;  %v673_v42 = vadd.s32 3, %v669_v13  ;;  %v4140_v60 = vld [vmem:[#allocation17_spill] sm:$0xff] }
 0x136   :  { %v668_v31 = vsel %vm3668_vm6, %v2888_v10, %v665_v11  ;;  %v824_v43 = vsel %vm820_vm3, %v804_v9, %v807_v52  ;;  %v826_v27 = vsel %vm822_vm8, %v810_v26, %v825_v0  ;;  %vm927_vm5 = vcmp.lt.s32.totalorder %v3744_v28, 4 }
 0x137   :  { %2719 = vcosq.f32 %v668_v31  ;;  %v2546_v17 = vadd.s32 4294967294, %v752_v41  ;;  %v3767_v47 = vmul.u32.u64.low %v836_v21, %v835_v12  ;;  %v3768_v2 = vmul.u32.u64.high %v836_v21, %v835_v12, %v3767_v47 }
 0x138   :  { %2721 = vsinq.f32 %v668_v31  ;;  %v3770_v57 = vmul.u32.u64.low %v836_v21, %v831_v22  ;;  %v3771_v59 = vmul.u32.u64.high %v836_v21, %v831_v22, %v3770_v57  ;;  %v827_v7 = vsel %vm821_vm7, %v824_v43, %v826_v27 }
 0x139   :  { %vm2547_vm1 = vcmp.lt.s32.totalorder %v2546_v17, 0  ;;  %v892_v52 = vand.u32 2147483647, %v4139_v62  ;;  %v3780_v26 = vsel %vm927_vm5, %v3748_v45, 920167782  ;;  %v4142_v49 = vor.u32 %v4140_v60, %v4141_v61 }
 0x13a   :  { %v3787_v40 = vand.u32 3, %v669_v13  ;;  %v755_v58 = vsel %vm2547_vm1, 0, %v2546_v17  ;;  %v3789_v18 = vand.u32 3, %v673_v42  ;;  %v3792_v30 = vadd.s32 %v3770_v57, %v3768_v2 }
 0x13b   :  { %v937_v4 = vsel %vm927_vm5, %v4142_v49, 1326507024  ;;  %v756_v44 = vsub.s32 32, %v755_v58  ;;  %v760_v23 = vsub.s32 4294967266, %v755_v58  ;;  %v843_v6 = vmul.u32 %v836_v21, %v827_v7 }
 0x13c   :  { %vm845_vm6 = vc.u32 %v3768_v2, %v3770_v57  ;;  %v846_v1 = vadd.s32 1, %v3771_v59  ;;  %v910_v5 = vshrl.u32 %v4111_v19, %v4134_v15  ;;  %v757_v14 = vshll.u32 %v3714_v3, %v755_v58 }
 0x13d   :  { %v758_v13 = vshrl.u32 %v3663_v48, %v756_v44  ;;  %v761_v32 = vadd.s32 127, %v760_v23  ;;  %v899_v37 = vand.u32 8388607, %v892_v52  ;;  %v912_v51 = vshll.u32 %v4111_v19, %v4130_v16 }
 0x13e   :  { %v847_v36 = vsel %vm845_vm6, %v846_v1, %v3771_v59  ;;  %v913_v0 = vshrl.u32 %v4112_v55, %v4134_v15  ;;  %v915_v20 = vshll.u32 %v4112_v55, %v4130_v16  ;;  %v916_v48 = vshrl.u32 %v4113_v25, %v4134_v15 }
 0x13f   :  { %v759_v29 = vor.u32 %v758_v13, %v757_v14  ;;  %v762_v50 = vshll.u32 %v761_v32, 23  ;;  %v848_v3 = vadd.s32 %v847_v36, %v843_v6  ;;  %vm1502_vm9 = vcmp.lt.s32.totalorder %v3787_v40, 2 }
 0x140   :  { %vm1503_vm4 = vcmp.eq.s32.totalorder %v3787_v40, 0  ;;  %vm686_vm10 = vcmp.lt.s32.totalorder %v2896_v24, 0  ;;  %v909_v19 = vshll.u32 %v4110_v56, %v4130_v16  ;;  %v914_v54 = vor.u32 %v913_v0, %v912_v51 }
 0x141   :  { %vm672_vm11 = vweird.f32 %v2888_v10  ;;  %vm3819_vm14 = vcmp.le.f32.partialorder %v684_v46, 0.7853982  ;;  %v763_v34 = vor.u32 4788187, %v762_v50  ;;  %v849_v25 = vadd.s32 536870912, %v848_v3 }
 0x142   :  { %v917_v53 = vor.u32 %v916_v48, %v915_v20  ;;  %vm926_vm15 = vcmp.lt.s32.totalorder %v3744_v28, 3  ;;  %vm1506_vm2 = vcmp.eq.s32.totalorder %v3787_v40, 2  ;;  %v900_v9 = vor.u32 8388608, %v899_v37 }
 0x143   :  { %v911_v22 = vor.u32 %v910_v5, %v909_v19  ;;  %v938_v16 = vsel %vm926_vm15, %v3748_v45, %v937_v4  ;;  %vm675_vm13 = vcmp.lt.s32.totalorder %v3789_v18, 2  ;;  %v764_v11 = vand.u32 2147483647, %v763_v34 }
 0x144   :  { %v766_v46 = vcvt.s32.f32 %v759_v29  ;;  %v3829_v41 = vshrl.u32 %v849_v25, 30  ;;  %v2720_v12 = vpop.eup %2719  ;;  %vm676_vm8 = vcmp.eq.s32.totalorder %v3789_v18, 0  ;;  %vm679_vm3 = vcmp.eq.s32.totalorder %v3789_v18, 2 }
 0x145   :  { %v770_v21 = vsub.s32 4, %v3702_v35  ;;  %vm924_vm7 = vcmp.lt.s32.totalorder %v3744_v28, 1  ;;  %v2722_v31 = vpop.eup %2721  ;;  %v680_v42 = vxor.u32 2147483648, %v2720_v12  ;;  %vm925_vm1 = vcmp.lt.s32.totalorder %v3744_v28, 2 }
 0x146   :  { %v767_v43 = vmul.f32 %v766_v46, %v764_v11  ;;  %v851_v45 = vshll.u32 %v3829_v41, 30  ;;  %v936_v27 = vsel %vm924_vm7, %v914_v54, %v917_v53  ;;  %v677_v17 = vxor.u32 2147483648, %v2722_v31 }
 0x147   :  { %v932_v47 = vsel %vm924_vm7, %v911_v22, %v914_v54  ;;  %v940_v2 = vshll.u32 %v900_v9, 8  ;;  %v1508_v57 = vsel %vm1506_vm2, %v680_v42, %v2722_v31  ;;  %v681_v59 = vsel %vm679_vm3, %v680_v42, %v2722_v31 }
 0x148   :  { %v768_v7 = vxor.u32 2147483648, %v767_v43  ;;  %v852_v60 = vsub.s32 %v848_v3, %v851_v45  ;;  %v1505_v61 = vsel %vm1503_vm4, %v2720_v12, %v677_v17  ;;  %v678_v49 = vsel %vm676_vm8, %v2720_v12, %v677_v17 }
 0x149   :  { %v934_v4 = vsel %vm926_vm15, %v917_v53, %v3780_v26  ;;  %v939_v58 = vsel %vm925_vm1, %v936_v27, %v938_v16  ;;  %v1509_v44 = vsel %vm1502_vm9, %v1505_v61, %v1508_v57  ;;  %v682_v23 = vsel %vm675_vm13, %v678_v49, %v681_v59 }
 0x14a   :  { %v769_v6 = vsel %vm686_vm10, %v768_v7, %v767_v43  ;;  %v854_v1 = vsub.s32 0, %v852_v60  ;;  %v1510_v5 = vsel %vm672_vm11, nan, %v1509_v44  ;;  %v683_v14 = vsel %vm672_vm11, nan, %v682_v23 }
 0x14b   :  { %v772_v26 = vsel %vm3819_vm14, %v2896_v24, %v769_v6  ;;  %v929_v40 = vsel %vm927_vm5, %v917_v53, 2102212464  ;;  %2633 = vmatprep.mubr.msk.f32.mxu0 %vm1822_vm12, %v1510_v5  ;;  %2647 = vmatprep.mubr.msk.f32.mxu1 %vm1822_vm12, %v683_v14  ;;  %v908_v13 = vshrl.u32 %v4110_v56, %v4134_v15  ;;  %v935_v10 = vsel %vm925_vm1, %v932_v47, %v934_v4 }
 0x14c   :  { %2723 = vcosq.f32 %v772_v26  ;;  %v2549_v18 = vmin.u32 %v854_v1, %v852_v60  ;;  %v771_v32 = vsel %vm686_vm10, %v770_v21, %v3702_v35  ;;  %v930_v20 = vsel %vm926_vm15, %v914_v54, %v929_v40 }
 0x14d   :  { %2725 = vsinq.f32 %v772_v26  ;;  %v3876_v37 = vmul.u32.u64.low %v940_v2, %v939_v58  ;;  %v3877_v36 = vmul.u32.u64.high %v940_v2, %v939_v58, %v3876_v37  ;;  %v928_v0 = vsel %vm924_vm7, %v908_v13, %v911_v22 }
 0x14e   :  { %v856_v51 = vclz %v2549_v18  ;;  %v3883_v29 = vmul.u32.u64.low %v940_v2, %v935_v10  ;;  %v3884_v56 = vmul.u32.u64.high %v940_v2, %v935_v10, %v3883_v29  ;;  %v773_v15 = vsel %vm3819_vm14, 0, %v771_v32 }
 0x14f   :  { %v931_v35 = vsel %vm925_vm1, %v928_v0, %v930_v20  ;;  %v777_v48 = vadd.s32 3, %v773_v15  ;;  %v1604_v9 = vand.u32 3, %v773_v15  ;;  %vm776_vm9 = vweird.f32 %v2896_v24 }
 0x150   :  { %v2550_v50 = vadd.s32 4294967294, %v856_v51  ;;  %v3891_v3 = vadd.s32 %v3883_v29, %v3877_v36  ;;  %vm949_vm6 = vc.u32 %v3877_v36, %v3883_v29  ;;  %v950_v54 = vadd.s32 1, %v3884_v56 }
 0x151   :  { %v947_v53 = vmul.u32 %v940_v2, %v931_v35  ;;  %v778_v46 = vand.u32 3, %v777_v48  ;;  %vm1606_vm4 = vcmp.eq.s32.totalorder %v1604_v9, 0  ;;  %vm1609_vm10 = vcmp.eq.s32.totalorder %v1604_v9, 2 }
 0x152   :  { %vm2551_vm5 = vcmp.lt.s32.totalorder %v2550_v50, 0  ;;  %v951_v55 = vsel %vm949_vm6, %v950_v54, %v3884_v56  ;;  %vm1605_vm15 = vcmp.lt.s32.totalorder %v1604_v9, 2  ;;  %vm790_vm13 = vcmp.lt.s32.totalorder %v4135_v39, 0 }
 0x153   :  { %v859_v19 = vsel %vm2551_vm5, 0, %v2550_v50  ;;  %v952_v11 = vadd.s32 %v951_v55, %v947_v53  ;;  %vm780_vm11 = vcmp.eq.s32.totalorder %v778_v46, 0  ;;  %vm783_vm14 = vcmp.eq.s32.totalorder %v778_v46, 2 }
 0x154   :  { %v860_v34 = vsub.s32 32, %v859_v19  ;;  %v864_v25 = vsub.s32 4294967266, %v859_v19  ;;  %v861_v22 = vshll.u32 %v852_v60, %v859_v19  ;;  %vm779_vm2 = vcmp.lt.s32.totalorder %v778_v46, 2 }
 0x155   :  { %v953_v31 = vadd.s32 536870912, %v952_v11  ;;  %v874_v14 = vsub.s32 4, %v3829_v41  ;;  %vm789_vm8 = vcmp.le.f32.partialorder %v788_v38, 0.7853982 }
 0x156   :  { %v862_v28 = vshrl.u32 %v3792_v30, %v860_v34  ;;  %v865_v16 = vadd.s32 127, %v864_v25 }
 0x157   :  { %v3898_v17 = vshrl.u32 %v953_v31, 30  ;;  %v875_v13 = vsel %vm790_vm13, %v874_v14, %v3829_v41 }
 0x158   :  { %v863_v12 = vor.u32 %v862_v28, %v861_v22  ;;  %v866_v21 = vshll.u32 %v865_v16, 23  ;;  %v877_v32 = vsel %vm789_vm8, 0, %v875_v13 }
 0x159   :  { %v2724_v42 = vpop.eup %2723  ;;  %v955_v7 = vshll.u32 %v3898_v17, 30  ;;  %v881_v0 = vadd.s32 3, %v877_v32  ;;  %v1707_v50 = vand.u32 3, %v877_v32  ;;  %v978_v31 = vsub.s32 4, %v3898_v17 }
 0x15a   :  { %v2726_v43 = vpop.eup %2725  ;;  %v784_v45 = vxor.u32 2147483648, %v2724_v42  ;;  %v867_v27 = vor.u32 4788187, %v866_v21  ;;  %v870_v30 = vcvt.s32.f32 %v863_v12 }
 0x15b   :  { %v781_v47 = vxor.u32 2147483648, %v2726_v43  ;;  %v956_v44 = vsub.s32 %v952_v11, %v955_v7  ;;  %v882_v35 = vand.u32 3, %v881_v0  ;;  %vm1709_vm7 = vcmp.eq.s32.totalorder %v1707_v50, 0 }
 0x15c   :  { %v1611_v2 = vsel %vm1609_vm10, %v784_v45, %v2726_v43  ;;  %v785_v57 = vsel %vm783_vm14, %v784_v45, %v2726_v43  ;;  %v868_v59 = vand.u32 2147483647, %v867_v27  ;;  %vm1712_vm1 = vcmp.eq.s32.totalorder %v1707_v50, 2 }
 0x15d   :  { %v1608_v60 = vsel %vm1606_vm4, %v2724_v42, %v781_v47  ;;  %v782_v61 = vsel %vm780_vm11, %v2724_v42, %v781_v47  ;;  %v958_v5 = vsub.s32 0, %v956_v44  ;;  %vm887_vm5 = vcmp.eq.s32.totalorder %v882_v35, 2 }
 0x15e   :  { %v1612_v49 = vsel %vm1605_vm15, %v1608_v60, %v1611_v2  ;;  %v786_v4 = vsel %vm779_vm2, %v782_v61, %v785_v57  ;;  %v871_v58 = vmul.f32 %v870_v30, %v868_v59  ;;  %vm884_vm6 = vcmp.eq.s32.totalorder %v882_v35, 0 }
 0x15f   :  { %v1613_v23 = vsel %vm776_vm9, nan, %v1612_v49  ;;  %v787_v6 = vsel %vm776_vm9, nan, %v786_v4  ;;  %v2553_v40 = vmin.u32 %v958_v5, %v956_v44  ;;  %vm1708_vm9 = vcmp.lt.s32.totalorder %v1707_v50, 2 }
 0x160   :  { %2634 = vmatmul.mubr.msk.f32.gmra.mxu0 %vm1822_vm12, %v1613_v23  ;;  %2648 = vmatmul.mubr.msk.f32.gmra.mxu1 %vm1822_vm12, %v787_v6  ;;  %v872_v1 = vxor.u32 2147483648, %v871_v58  ;;  %vm883_vm4 = vcmp.lt.s32.totalorder %v882_v35, 2  ;;  %vm880_vm10 = vweird.f32 %v4135_v39  ;;  %vm894_vm11 = vcmp.lt.s32.totalorder %v4139_v62, 0 }
 0x161   :  { %v960_v24 = vclz %v2553_v40  ;;  %vm893_vm14 = vcmp.le.f32.partialorder %v892_v52, 0.7853982 }
 0x162   :  { %v873_v26 = vsel %vm790_vm13, %v872_v1, %v871_v58  ;;  %v2604_v1 = vld [vmem:[%s4060_s5] ss:$0 sm:$0xff] }
 0x163   :  { %v876_v18 = vsel %vm789_vm8, %v4135_v39, %v873_v26  ;;  %v2554_v10 = vadd.s32 4294967294, %v960_v24  ;;  %v979_v39 = vsel %vm894_vm11, %v978_v31, %v3898_v17 }
 0x164   :  { %2727 = vcosq.f32 %v876_v18  ;;  %v981_v45 = vsel %vm893_vm14, 0, %v979_v39 }
 0x165   :  { %2729 = vsinq.f32 %v876_v18  ;;  %vm2555_vm3 = vcmp.lt.s32.totalorder %v2554_v10, 0  ;;  %v985_v27 = vadd.s32 3, %v981_v45  ;;  %v1810_v47 = vand.u32 3, %v981_v45 }
 0x166   :  { %v963_v37 = vsel %vm2555_vm3, 0, %v2554_v10 }
 0x167   :  { %v964_v36 = vsub.s32 32, %v963_v37  ;;  %v968_v51 = vsub.s32 4294967266, %v963_v37  ;;  %v965_v20 = vshll.u32 %v956_v44, %v963_v37  ;;  %v986_v30 = vand.u32 3, %v985_v27 }
 0x168   :  { %vm1815_vm15 = vcmp.eq.s32.totalorder %v1810_v47, 2  ;;  %vm1812_vm13 = vcmp.eq.s32.totalorder %v1810_v47, 0  ;;  %vm1811_vm3 = vcmp.lt.s32.totalorder %v1810_v47, 2 }
 0x169   :  { %v966_v29 = vshrl.u32 %v3891_v3, %v964_v36  ;;  %v969_v38 = vadd.s32 127, %v968_v51  ;;  %vm991_vm2 = vcmp.eq.s32.totalorder %v986_v30, 2  ;;  %vm988_vm8 = vcmp.eq.s32.totalorder %v986_v30, 0 }
 0x16b   :  { %v967_v56 = vor.u32 %v966_v29, %v965_v20  ;;  %v970_v15 = vshll.u32 %v969_v38, 23 }
 0x16d   :  { %v971_v48 = vor.u32 4788187, %v970_v15  ;;  %v974_v25 = vcvt.s32.f32 %v967_v56 }
 0x16f   :  { %v972_v34 = vand.u32 2147483647, %v971_v48 }
 0x171   :  { %v2728_v19 = vpop.eup %2727  ;;  %v975_v22 = vmul.f32 %v974_v25, %v972_v34 }
 0x172   :  { %v2730_v54 = vpop.eup %2729  ;;  %v888_v41 = vxor.u32 2147483648, %v2728_v19 }
 0x173   :  { %v885_v53 = vxor.u32 2147483648, %v2730_v54  ;;  %v976_v46 = vxor.u32 2147483648, %v975_v22 }
 0x174   :  { %v1714_v9 = vsel %vm1712_vm1, %v888_v41, %v2730_v54  ;;  %v889_v55 = vsel %vm887_vm5, %v888_v41, %v2730_v54  ;;  %vm984_vm1 = vweird.f32 %v4139_v62  ;;  %vm2119_vm5 = vcmask 261120  }
 0x175   :  { %v1711_v3 = vsel %vm1709_vm7, %v2728_v19, %v885_v53  ;;  %v886_v28 = vsel %vm884_vm6, %v2728_v19, %v885_v53  ;;  %v977_v42 = vsel %vm894_vm11, %v976_v46, %v975_v22  ;;  %vm987_vm7 = vcmp.lt.s32.totalorder %v986_v30, 2 }
 0x176   :  { %v1715_v16 = vsel %vm1708_vm9, %v1711_v3, %v1714_v9  ;;  %v890_v11 = vsel %vm883_vm4, %v886_v28, %v889_v55  ;;  %v980_v43 = vsel %vm893_vm14, %v4139_v62, %v977_v42  ;;  %v2605_v62 = vld [vmem:[%s4061_s6] ss:$0 sm:$0xff]  ;;  %vm2188_vm6 = vcmask 130112  }
 0x177   :  { %v1716_v12 = vsel %vm880_vm10, nan, %v1715_v16  ;;  %v891_v21 = vsel %vm880_vm10, nan, %v890_v11  ;;  %2731 = vcosq.f32 %v980_v43  ;;  %vm2217_vm9 = vcmask 1041409  }
 0x178   :  { %2636 = vmatprep.mubr.msk.f32.mxu0 %vm1822_vm12, %v1716_v12  ;;  %2650 = vmatprep.mubr.msk.f32.mxu1 %vm1822_vm12, %v891_v21  ;;  %2733 = vsinq.f32 %v980_v43  ;;  %vm2219_vm4 = vcmask 1042434   ;;  %vm2221_vm10 = vcmask 1043459   ;;  %vm2487_vm14 = vcmask 3072  }
 0x184   :  { %v2732_v2 = vpop.eup %2731 }
 0x185   :  { %v2734_v57 = vpop.eup %2733  ;;  %v992_v59 = vxor.u32 2147483648, %v2732_v2 }
 0x186   :  { %v989_v7 = vxor.u32 2147483648, %v2734_v57 }
 0x187   :  { %v1817_v60 = vsel %vm1815_vm15, %v992_v59, %v2734_v57  ;;  %v993_v52 = vsel %vm991_vm2, %v992_v59, %v2734_v57 }
 0x188   :  { %v1814_v61 = vsel %vm1812_vm13, %v2732_v2, %v989_v7  ;;  %v990_v49 = vsel %vm988_vm8, %v2732_v2, %v989_v7 }
 0x189   :  { %v1818_v17 = vsel %vm1811_vm3, %v1814_v61, %v1817_v60  ;;  %v994_v4 = vsel %vm987_vm7, %v990_v49, %v993_v52  ;;  %v2154_v61 = vand.u32 65535, %v3339_v33  ;;  %v2159_v49 = vpop.xlane.xlu0 %2158 }
 0x18a   :  { %v1819_v58 = vsel %vm984_vm1, nan, %v1818_v17  ;;  %v995_v44 = vsel %vm984_vm1, nan, %v994_v4 }
 0x18b   :  { %2637 = vmatmul.mubr.msk.f32.gmra.mxu0 %vm1822_vm12, %v1819_v58  ;;  %2651 = vmatmul.mubr.msk.f32.gmra.mxu1 %vm1822_vm12, %v995_v44  ;;  %v2156_v44 = vcvt.s32.f32 %v2154_v61  ;;  %vm2160_vm12 = vcmp.eq.f32.partialorder %v3389_v8, %v2159_v49 }
 0x1c5   :  { %v2629_v23 = vpop.f32.mrf.mxu0  ;;  %v2643_v6 = vpop.f32.mrf.mxu1 }
 0x1c6   :  { %v2048_v5 = vadd.f32 %v2643_v6, %v2629_v23  ;;  %v2161_v23 = vsel %vm2160_vm12, %v2156_v44, inf }
 0x1c7   :  { %v1913_v14 = vpop.f32.mrf.mxu0  ;;  %v2042_v26 = vpop.f32.mrf.mxu1 }
 0x1c8   :  { %v2089_v40 = vadd.f32 %v2604_v1, %v2048_v5  ;;  %v2043_v18 = vadd.f32 %v2042_v26, %v1913_v14  ;;  %v2183_v14 = vadd.s32 4294967288, %v2924_v63  ;;  %v4145_v26 = vld [vmem:[#allocation5_spill] sm:$0xff] }
 0x1ca   :  { %v2097_v24 = vmax.f32 %v2089_v40, 0.0  ;;  %v2088_v13 = vadd.f32 %v2604_v1, %v2043_v18  ;;  %v3953_v40 = vsub.s32 %v2924_v63, %v4145_v26  ;;  %v3960_v8 = vsub.s32 %v2183_v14, %v4145_v26 }
 0x1cc   :  { %v2096_v10 = vmax.f32 %v2088_v13, 0.0  ;;  %v2112_v32 = vmul.f32 %v2605_v62, %v2097_v24 }
 0x1ce   :  { %v2123_v37 = vsel %vm2119_vm5, %v2112_v32, 0.0  ;;  %v2111_v36 = vmul.f32 %v2605_v62, %v2096_v10 }
 0x1cf   :  { %2124 = vadd.xlane.f32.xlu1 %v2123_v37 }
 0x1d0   :  { %v2120_v51 = vsel %vm2119_vm5, %v2111_v36, 0.0 }
 0x1d1   :  { %2121 = vadd.xlane.f32.xlu0 %v2120_v51 }
 0x1f3   :  { %v2632_v0 = vpop.f32.mrf.mxu0 }
 0x1f4   :  { %v2646_v20 = vpop.f32.mrf.mxu1 }
 0x1f5   :  { %v2058_v29 = vadd.f32 %v2646_v20, %v2632_v0  ;;  %v1923_v38 = vpop.f32.mrf.mxu0  ;;  %v2165_v20 = vcvt.f32.s32 %v2159_v49 }
 0x1f6   :  { %v2052_v56 = vpop.f32.mrf.mxu1 }
 0x1f7   :  { %v2091_v15 = vadd.f32 %v2604_v1, %v2058_v29  ;;  %v2053_v50 = vadd.f32 %v2052_v56, %v1923_v38 }
 0x1f9   :  { %v2099_v35 = vmax.f32 %v2091_v15, 0.0  ;;  %v2090_v48 = vadd.f32 %v2604_v1, %v2053_v50 }
 0x1fb   :  { %v2098_v19 = vmax.f32 %v2090_v48, 0.0  ;;  %v2114_v54 = vmul.f32 %v2605_v62, %v2099_v35 }
 0x1fd   :  { %v2129_v41 = vsel %vm2119_vm5, %v2114_v54, 0.0  ;;  %v2113_v34 = vmul.f32 %v2605_v62, %v2098_v19 }
 0x1fe   :  { %2130 = vadd.xlane.f32.xlu1 %v2129_v41 }
 0x1ff   :  { %v2126_v25 = vsel %vm2119_vm5, %v2113_v34, 0.0  ;;  %v2166_v34 = vshll.u32 %v2165_v20, 16 }
 0x200   :  { %2127 = vadd.xlane.f32.xlu0 %v2126_v25 }
 0x220   :  { %v2635_v53 = vpop.f32.mrf.mxu0  ;;  %v2649_v9 = vpop.f32.mrf.mxu1 }
 0x221   :  { %v2068_v55 = vadd.f32 %v2649_v9, %v2635_v53 }
 0x222   :  { %v1933_v22 = vpop.f32.mrf.mxu0  ;;  %v2062_v3 = vpop.f32.mrf.mxu1 }
 0x223   :  { %v2093_v28 = vadd.f32 %v2604_v1, %v2068_v55  ;;  %v2063_v16 = vadd.f32 %v2062_v3, %v1933_v22  ;;  %v2771_v55 = vmov 0.0   ;;  %v4146_v3 = vld [vmem:[#allocation6_spill] sm:$0xff] }
 0x225   :  { %v2101_v11 = vmax.f32 %v2093_v28, 0.0  ;;  %v2092_v46 = vadd.f32 %v2604_v1, %v2063_v16  ;;  %v4147_v16 = vld [vmem:[#allocation7_spill] sm:$0xff] }
 0x227   :  { %v2100_v12 = vmax.f32 %v2092_v46, 0.0  ;;  %v2116_v21 = vmul.f32 %v2605_v62, %v2101_v11  ;;  %v2238_v46 = vsub.s32 2, %v4145_v26 }
 0x229   :  { %v2135_v31 = vsel %vm2119_vm5, %v2116_v21, 0.0  ;;  %v2115_v42 = vmul.f32 %v2605_v62, %v2100_v12  ;;  %v2242_v21 = vsub.s32 3, %v4145_v26 }
 0x22a   :  { %2136 = vadd.xlane.f32.xlu1 %v2135_v31 }
 0x22b   :  { %v2132_v43 = vsel %vm2119_vm5, %v2115_v42, 0.0 }
 0x22c   :  { %2133 = vadd.xlane.f32.xlu0 %v2132_v43 }
 0x24b   :  { %v2638_v39 = vpop.f32.mrf.mxu0  ;;  %v2652_v45 = vpop.f32.mrf.mxu1 }
 0x24c   :  { %v2078_v27 = vadd.f32 %v2652_v45, %v2638_v39 }
 0x24d   :  { %v1943_v47 = vpop.f32.mrf.mxu0  ;;  %v2072_v30 = vpop.f32.mrf.mxu1 }
 0x24e   :  { %v2095_v2 = vadd.f32 %v2604_v1, %v2078_v27  ;;  %v2073_v57 = vadd.f32 %v2072_v30, %v1943_v47 }
 0x250   :  { %v2103_v59 = vmax.f32 %v2095_v2, 0.0  ;;  %v2094_v7 = vadd.f32 %v2604_v1, %v2073_v57 }
 0x252   :  { %v2102_v60 = vmax.f32 %v2094_v7, 0.0  ;;  %v2118_v52 = vmul.f32 %v2605_v62, %v2103_v59 }
 0x254   :  { %v2141_v17 = vsel %vm2119_vm5, %v2118_v52, 0.0  ;;  %v2117_v4 = vmul.f32 %v2605_v62, %v2102_v60 }
 0x255   :  { %2142 = vadd.xlane.f32.xlu1 %v2141_v17 }
 0x256   :  { %v2138_v58 = vsel %vm2119_vm5, %v2117_v4, 0.0 }
 0x257   :  { %2139 = vadd.xlane.f32.xlu0 %v2138_v58 }
 0x258   :  { %v3944_v1 = vpop.xlane.xlu1 %2124 }
 0x259   :  { %v2187_v51 = vrot.slane %v3944_v1, %v3960_v8 }
 0x25a   :  { %v3942_v6 = vpop.xlane.xlu0 %2121 }
 0x25b   :  { %2162 = vmin.xlane.f32.xlu0 %v2161_v23  ;;  %v2182_v10 = vrot.slane %v3942_v6, %v3953_v40 }
 0x25d   :  { %v2189_v56 = vsel %vm2188_vm6, %v2187_v51, %v2182_v10 }
 0x287   :  { %v3948_v33 = vpop.xlane.xlu1 %2130 }
 0x288   :  { %v2197_v32 = vrot.slane %v3948_v33, %v3960_v8 }
 0x289   :  { %v3946_v5 = vpop.xlane.xlu0 %2127 }
 0x28a   :  { %v2193_v24 = vrot.slane %v3946_v5, %v3953_v40 }
 0x28c   :  { %v2198_v0 = vsel %vm2188_vm6, %v2197_v32, %v2193_v24 }
 0x28d   :  { %v2218_v35 = vsel %vm2217_vm9, %v2198_v0, %v2189_v56 }
 0x2b3   :  { %v3957_v62 = vpop.xlane.xlu1 %2136 }
 0x2b4   :  { %v2206_v37 = vrot.slane %v3957_v62, %v3960_v8 }
 0x2b5   :  { %v3955_v18 = vpop.xlane.xlu0 %2133 }
 0x2b6   :  { %v2202_v13 = vrot.slane %v3955_v18, %v3953_v40 }
 0x2b8   :  { %v2207_v38 = vsel %vm2188_vm6, %v2206_v37, %v2202_v13 }
 0x2b9   :  { %v2220_v19 = vsel %vm2219_vm4, %v2207_v38, %v2218_v35 }
 0x2de   :  { %v3972_v36 = vpop.xlane.xlu1 %2142 }
 0x2df   :  { %v2215_v15 = vrot.slane %v3972_v36, %v3960_v8 }
 0x2e0   :  { %v3977_v29 = vpop.xlane.xlu0 %2139 }
 0x2e1   :  { %v2211_v50 = vrot.slane %v3977_v29, %v3953_v40 }
 0x2e3   :  { %v2216_v48 = vsel %vm2188_vm6, %v2215_v15, %v2211_v50 }
 0x2e4   :  { %v2163_v54 = vpop.xlane.xlu0 %2162  ;;  %v2222_v41 = vsel %vm2221_vm10, %v2216_v48, %v2220_v19 }
 0x2e5   :  { %v2164_v25 = vcvt.f32.s32 %v2163_v54  ;;  %v2224_v53 = vsel %vm2147_vm0, %v2222_v41, -inf }
 0x2e6   :  { %2225 = vmax.xlane.f32.xlu1 %v2224_v53 }
 0x2e7   :  { %v2167_v9 = vadd.s32 %v2166_v34, %v2164_v25 }
 0x2e9   :  { %vm2168_vm11 = vcmp.eq.s32.totalorder %v2924_v63, %v2167_v9 }
 0x2ea   :  { %v2606_v22 = vsel %vm2168_vm11, 1.0, %v2771_v55 }
 0x2eb   :  { %v2354_v28 = vrot.slane %v2606_v22, %v4146_v3  ;;  %v2365_v11 = vrot.slane %v2606_v22, %v4147_v16  ;;  %v2376_v12 = vrot.slane %v2606_v22, %v2238_v46  ;;  %v2387_v31 = vrot.slane %v2606_v22, %v2242_v21 }
 0x2ed   :  { %2356 = vbcast.lane.b32.xlu0 %v2354_v28, 256 }
 0x2f1   :  { %2371 = vbcast.lane.b32.xlu0 %v2365_v11, 264 }
 0x2f5   :  { %2382 = vbcast.lane.b32.xlu0 %v2376_v12, 264 }
 0x2f7   :  { %2360 = vbcast.lane.b32.xlu1 %v2354_v28, 264 }
 0x2f9   :  { %2393 = vbcast.lane.b32.xlu0 %v2387_v31, 264 }
 0x2fb   :  { %2367 = vbcast.lane.b32.xlu1 %v2365_v11, 256 }
 0x2ff   :  { %2378 = vbcast.lane.b32.xlu1 %v2376_v12, 256 }
 0x303   :  { %2389 = vbcast.lane.b32.xlu1 %v2387_v31, 256 }
 0x35f   :  { %v2357_v51 = vpop.permute.xlu0 %2356 }
 0x360   :  { %v2403_v38 = vmul.f32 %v2357_v51, %v3942_v6 }
 0x363   :  { %v2372_v50 = vpop.permute.xlu0 %2371 }
 0x364   :  { %v2406_v34 = vmul.f32 %v2372_v50, %v3948_v33 }
 0x367   :  { %v2383_v41 = vpop.permute.xlu0 %2382 }
 0x368   :  { %v2408_v25 = vmul.f32 %v2383_v41, %v3957_v62 }
 0x36b   :  { %v2394_v53 = vpop.permute.xlu0 %2393 }
 0x36f   :  { %v3995_v63 = vpop.xlane.xlu1 %2225 }
 0x370   :  { %v2231_v42 = vrot.slane %v3995_v63, %v4146_v3  ;;  %v2235_v43 = vrot.slane %v3995_v63, %v4147_v16  ;;  %v2239_v39 = vrot.slane %v3995_v63, %v2238_v46  ;;  %v2243_v30 = vrot.slane %v3995_v63, %v2242_v21 }
 0x372   :  { %v2248_v45 = vsub.f32 %v3942_v6, %v2231_v42  ;;  %v2249_v27 = vsub.f32 %v3944_v1, %v2231_v42  ;;  %v2250_v47 = vsub.f32 %v3946_v5, %v2235_v43  ;;  %v2252_v2 = vsub.f32 %v3955_v18, %v2239_v39 }
 0x373   :  { %v2251_v7 = vsub.f32 %v3948_v33, %v2235_v43  ;;  %v2254_v52 = vsub.f32 %v3977_v29, %v2243_v30  ;;  %v2253_v49 = vsub.f32 %v3957_v62, %v2239_v39  ;;  %v2255_v58 = vsub.f32 %v3972_v36, %v2243_v30  ;;  %v2361_v24 = vpop.permute.xlu1 %2360 }
 0x374   :  { %v2256_v57 = vmul.f32 1.442695, %v2248_v45  ;;  %v2258_v59 = vmul.f32 1.442695, %v2249_v27  ;;  %v2260_v60 = vmul.f32 1.442695, %v2250_v47  ;;  %v2404_v48 = vmul.f32 %v2361_v24, %v3944_v1 }
 0x375   :  { %v2264_v61 = vmul.f32 1.442695, %v2252_v2  ;;  %v2262_v17 = vmul.f32 1.442695, %v2251_v7  ;;  %v2268_v4 = vmul.f32 1.442695, %v2254_v52 }
 0x376   :  { %2735 = vpow2.f32 %v2256_v57  ;;  %v2266_v44 = vmul.f32 1.442695, %v2253_v49  ;;  %v2270_v23 = vmul.f32 1.442695, %v2255_v58 }
 0x377   :  { %2737 = vpow2.f32 %v2258_v59  ;;  %v2368_v0 = vpop.permute.xlu1 %2367 }
 0x378   :  { %2739 = vpow2.f32 %v2260_v60  ;;  %v2405_v35 = vmul.f32 %v2368_v0, %v3946_v5  ;;  %v2410_v5 = vmul.f32 %v2394_v53, %v3972_v36 }
 0x379   :  { %2741 = vpow2.f32 %v2264_v61 }
 0x37a   :  { %2743 = vpow2.f32 %v2262_v17 }
 0x37b   :  { %2745 = vpow2.f32 %v2268_v4  ;;  %v2379_v56 = vpop.permute.xlu1 %2378 }
 0x37c   :  { %2747 = vpow2.f32 %v2266_v44  ;;  %v2407_v19 = vmul.f32 %v2379_v56, %v3955_v18 }
 0x37d   :  { %2749 = vpow2.f32 %v2270_v23 }
 0x37f   :  { %v2390_v54 = vpop.permute.xlu1 %2389 }
 0x380   :  { %v2409_v6 = vmul.f32 %v2390_v54, %v3977_v29 }
 0x383   :  { %v2736_v14 = vpop.eup %2735 }
 0x384   :  { %v2738_v26 = vpop.eup %2737  ;;  %2281 = vperm.xlu1 %2701, %v2736_v14  }
 0x385   :  { %2284 = vperm.xlu0 %2702, %v2738_v26   ;;  %v2740_v13 = vpop.eup %2739 }
 0x386   :  { %v2742_v10 = vpop.eup %2741 }
 0x387   :  { %v2744_v32 = vpop.eup %2743 }
 0x388   :  { %2287 = vperm.xlu1 %2701, %v2740_v13   ;;  %v2746_v37 = vpop.eup %2745 }
 0x389   :  { %2293 = vperm.xlu0 %2702, %v2742_v10   ;;  %v2748_v20 = vpop.eup %2747 }
 0x38a   :  { %v2750_v15 = vpop.eup %2749 }
 0x38c   :  { %2290 = vperm.xlu1 %2701, %v2744_v32  }
 0x38d   :  { %2299 = vperm.xlu0 %2702, %v2746_v37  }
 0x390   :  { %2296 = vperm.xlu1 %2701, %v2748_v20  }
 0x391   :  { %2420 = vperm.xlu0 %2702, %v2403_v38  }
 0x394   :  { %2302 = vperm.xlu1 %2701, %v2750_v15  }
 0x395   :  { %2426 = vperm.xlu0 %2702, %v2405_v35  }
 0x398   :  { %2423 = vperm.xlu1 %2701, %v2404_v48  }
 0x399   :  { %2432 = vperm.xlu0 %2702, %v2407_v19  }
 0x39c   :  { %2429 = vperm.xlu1 %2701, %v2406_v34  }
 0x39d   :  { %2438 = vperm.xlu0 %2702, %v2409_v6  }
 0x3a0   :  { %2435 = vperm.xlu1 %2701, %v2408_v25  }
 0x3a4   :  { %2441 = vperm.xlu1 %2701, %v2410_v5  }
 0x3ff   :  { %v2282_v1 = vpop.permute.xlu1 %2281 }
 0x400   :  { %v2285_v9 = vpop.permute.xlu0 %2284  ;;  %v2307_v29 = vrot.slane %v2282_v1, %v3953_v40 }
 0x401   :  { %v2311_v16 = vrot.slane %v2285_v9, %v3960_v8 }
 0x403   :  { %v2288_v18 = vpop.permute.xlu1 %2287  ;;  %v2312_v42 = vsel %vm2188_vm6, %v2311_v16, %v2307_v29 }
 0x404   :  { %v2294_v55 = vpop.permute.xlu0 %2293  ;;  %v2316_v62 = vrot.slane %v2288_v18, %v3953_v40 }
 0x405   :  { %v2325_v36 = vrot.slane %v2294_v55, %v3953_v40 }
 0x407   :  { %v2291_v22 = vpop.permute.xlu1 %2290 }
 0x408   :  { %v2300_v3 = vpop.permute.xlu0 %2299  ;;  %v2320_v28 = vrot.slane %v2291_v22, %v3960_v8 }
 0x409   :  { %v2334_v43 = vrot.slane %v2300_v3, %v3953_v40 }
 0x40a   :  { %v2321_v12 = vsel %vm2188_vm6, %v2320_v28, %v2316_v62 }
 0x40b   :  { %v2297_v33 = vpop.permute.xlu1 %2296  ;;  %v2340_v27 = vsel %vm2217_vm9, %v2321_v12, %v2312_v42 }
 0x40c   :  { %v2329_v11 = vrot.slane %v2297_v33, %v3960_v8  ;;  %v2421_v46 = vpop.permute.xlu0 %2420 }
 0x40d   :  { %v2446_v23 = vrot.slane %v2421_v46, %v3953_v40 }
 0x40e   :  { %v2330_v21 = vsel %vm2188_vm6, %v2329_v11, %v2325_v36 }
 0x40f   :  { %v2303_v31 = vpop.permute.xlu1 %2302  ;;  %v2341_v30 = vsel %vm2219_vm4, %v2330_v21, %v2340_v27 }
 0x410   :  { %v2338_v39 = vrot.slane %v2303_v31, %v3960_v8  ;;  %v2427_v45 = vpop.permute.xlu0 %2426 }
 0x411   :  { %v2455_v49 = vrot.slane %v2427_v45, %v3953_v40 }
 0x412   :  { %v2339_v47 = vsel %vm2188_vm6, %v2338_v39, %v2334_v43 }
 0x413   :  { %v2424_v2 = vpop.permute.xlu1 %2423  ;;  %v2342_v57 = vsel %vm2221_vm10, %v2339_v47, %v2341_v30 }
 0x414   :  { %v2344_v59 = vsel %vm2147_vm0, %v2342_v57, 0.0  ;;  %v2433_v7 = vpop.permute.xlu0 %2432  ;;  %v2450_v17 = vrot.slane %v2424_v2, %v3960_v8 }
 0x415   :  { %2345 = vadd.xlane.f32.xlu0 %v2344_v59  ;;  %v2464_v58 = vrot.slane %v2433_v7, %v3953_v40 }
 0x416   :  { %v2451_v13 = vsel %vm2188_vm6, %v2450_v17, %v2446_v23 }
 0x417   :  { %v2430_v60 = vpop.permute.xlu1 %2429 }
 0x418   :  { %v2459_v52 = vrot.slane %v2430_v60, %v3960_v8  ;;  %v2439_v44 = vpop.permute.xlu0 %2438 }
 0x419   :  { %v2473_v10 = vrot.slane %v2439_v44, %v3953_v40 }
 0x41a   :  { %v2460_v14 = vsel %vm2188_vm6, %v2459_v52, %v2455_v49 }
 0x41b   :  { %v2436_v61 = vpop.permute.xlu1 %2435  ;;  %v2479_v37 = vsel %vm2217_vm9, %v2460_v14, %v2451_v13 }
 0x41c   :  { %v2468_v4 = vrot.slane %v2436_v61, %v3960_v8 }
 0x41e   :  { %v2469_v26 = vsel %vm2188_vm6, %v2468_v4, %v2464_v58 }
 0x41f   :  { %v2442_v24 = vpop.permute.xlu1 %2441  ;;  %v2480_v0 = vsel %vm2219_vm4, %v2469_v26, %v2479_v37 }
 0x420   :  { %v2477_v32 = vrot.slane %v2442_v24, %v3960_v8 }
 0x422   :  { %v2478_v51 = vsel %vm2188_vm6, %v2477_v32, %v2473_v10 }
 0x423   :  { %v2481_v20 = vsel %vm2221_vm10, %v2478_v51, %v2480_v0 }
 0x424   :  { %v2483_v38 = vsel %vm2147_vm0, %v2481_v20, 0.0 }
 0x425   :  { %2484 = vadd.xlane.f32.xlu1 %v2483_v38 }
 0x49e   :  { %v2346_v56 = vpop.xlane.xlu0 %2345 }
 0x49f   :  { %2751 = vlog2.f32 %v2346_v56 }
 0x4ac   :  { %v2752_v15 = vpop.eup %2751 }
 0x4ad   :  { %v2348_v50 = vmul.f32 0.6931472, %v2752_v15 }
 0x4ae   :  { %v2485_v40 = vpop.xlane.xlu1 %2484 }
 0x4af   :  { %v2349_v35 = vadd.f32 %v2348_v50, %v3995_v63 }
 0x4b1   :  { %v2486_v8 = vsub.f32 %v2349_v35, %v2485_v40 }
 0x4b3   :  { %v2488_v48 = vsel %vm2487_vm14, %v2486_v8, 0.0 }
 0x4b4   :  { %2489 = vadd.xlane.f32.xlu0 %v2488_v48 }
 0x53d   :  { %v2490_v19 = vpop.xlane.xlu0 %2489 }
 0x53e   :  { %v2491_v54 = vrot.slane %v2490_v19, 4 }
 0x540   :  { %v2492_v41 = vadd.f32 %v2491_v54, %v2490_v19 }
 0x542   :  { %v2493_v34 = vrot.slane %v2492_v41, 2 }
 0x544   :  { %v2494_v6 = vadd.f32 %v2493_v34, %v2492_v41 }
 0x546   :  { %v2495_v25 = vrot.slane %v2494_v6, 1 }
 0x548   :  { %v2496_v53 = vadd.f32 %v2495_v25, %v2494_v6 }
 0x54a   :  { %2685 = vpush %v2496_v53 }
 0x57b   :  { %s2686_s5 = spop %2685 }
 0x57c   :  { %s2500_s6 = smul.f32 0.25, %s2686_s5 }
 0x57e   :  { %2502 = sst [smem:[#allocation2]] %s2500_s6 }
 0x57f   :  { %2510 = dma.smem_to_hbm %s2772_s24, 16, %s4062_s7, [#allocation3]  }
 0x580   :  { %2761 = dma.done.wait [#allocation3], 16  }
 0x581   :  { %2762 = vsyncadd [#allocation3], 4294967280 }
 0x582   :  { %2514 = sfence }
 0x583   :  { %2515 = vsyncpa [#allocation3], 1 }

</bundles_post_ra>
